<compile_context>
chip_gen: v6e
topology: v6e:2x2x1
jax: 0.10.0
libtpu: 0.0.40
codegen_flags: <defaults>
</compile_context>

<pallas_src>
import functools
import math

import jax
import jax.numpy as jnp
from jax.experimental import pallas as pl
from jax.experimental.pallas import tpu as pltpu


# ----------------------------------------------------------------------------
# tile-size helpers (pick even divisors; fall back to the full dim, which is
# always a legal block size)
# ----------------------------------------------------------------------------
def _row_tile(m, candidates=(256, 128, 64, 48, 32, 16, 8)):
    for c in candidates:
        if m % c == 0:
            return c
    return m


def _lane_tile(n, candidates=(512, 384, 256, 128)):
    for c in candidates:
        if n % c == 0:
            return c
    return n


# ----------------------------------------------------------------------------
# simple matmul + bias kernel (used for the patch embedding only)
# ----------------------------------------------------------------------------
def _linear_kernel(x_ref, w_ref, b_ref, o_ref):
    y = jnp.dot(x_ref[...].astype(jnp.bfloat16), w_ref[...],
                preferred_element_type=jnp.float32)
    y = y + b_ref[...].astype(jnp.float32)
    o_ref[...] = y.astype(o_ref.dtype)


def linear(x, w, b):
    M, K = x.shape
    _, N = w.shape
    tm = _row_tile(M)
    tn = _lane_tile(N)
    return pl.pallas_call(
        _linear_kernel,
        out_shape=jax.ShapeDtypeStruct((M, N), x.dtype),
        grid=(M // tm, N // tn),
        in_specs=[pl.BlockSpec((tm, K), lambda i, j: (i, 0)),
                  pl.BlockSpec((K, tn), lambda i, j: (0, j)),
                  pl.BlockSpec((1, tn), lambda i, j: (0, j))],
        out_specs=pl.BlockSpec((tm, tn), lambda i, j: (i, j)),
        compiler_params=pltpu.CompilerParams(
            dimension_semantics=("parallel", "parallel")),
    )(x, w, b.reshape(1, N))


# ----------------------------------------------------------------------------
# fused attention sub-block:  x = x + proj( MHSA( LN1(x) @ W_qkv + b_qkv ) )
# one grid step per batch row; qkv and per-head outputs stay in VMEM
# ----------------------------------------------------------------------------
def _attn_block_kernel(tok_ref, g_ref, bb_ref, qkvw_ref, qkvb_ref,
                       projw_ref, projb_ref, o_ref, attn_sc,
                       *, heads, dim, t_real, eps):
    x = tok_ref[0].astype(jnp.float32)                       # (T, D) residual
    # --- LayerNorm 1 (f32) ---
    mu = jnp.mean(x, axis=-1, keepdims=True)
    var = jnp.mean(jnp.square(x - mu), axis=-1, keepdims=True)
    xn = (x - mu) * jax.lax.rsqrt(var + jnp.float32(eps))
    xn = xn * g_ref[...].astype(jnp.float32) + bb_ref[...].astype(jnp.float32)

    # --- qkv projection; the 1/sqrt(dh) scale is pre-folded into the q
    #     columns of qkv_w / qkv_b (parameter prep), so no in-kernel scaling ---
    qkv = jnp.dot(xn.astype(jnp.bfloat16), qkvw_ref[...],
                  preferred_element_type=jnp.float32)
    qkv = qkv + qkvb_ref[...].astype(jnp.float32)            # (T, 3D) f32

    T = x.shape[0]
    dh = dim // heads
    # padded keys (index >= t_real) are masked out of the softmax
    key_ok = jax.lax.broadcasted_iota(jnp.int32, (1, T), 1) < t_real

    for h in range(heads):                                   # heads is small
        q = qkv[:, h * dh:(h + 1) * dh]
        k = qkv[:, dim + h * dh: dim + (h + 1) * dh]
        v = qkv[:, 2 * dim + h * dh: 2 * dim + (h + 1) * dh]
        # q @ k^T without materialising a transpose
        s = jax.lax.dot_general(
            q.astype(jnp.bfloat16), k.astype(jnp.bfloat16),
            (((1,), (1,)), ((), ())), preferred_element_type=jnp.float32)
        s = jnp.where(key_ok, s, jnp.float32(-jnp.inf))
        m = jnp.max(s, axis=-1, keepdims=True)
        p = jnp.exp(s - m)                                   # f32 softmax
        p = p * pl.reciprocal(jnp.sum(p, axis=-1, keepdims=True), approx=True)
        o_h = jnp.dot(p.astype(jnp.bfloat16), v.astype(jnp.bfloat16),
                      preferred_element_type=jnp.float32)
        # eager per-head store into VMEM scratch (bounds live ranges; the HBM
        # writeback below stays one lane-dense (T, D) block)
        attn_sc[:, h * dh:(h + 1) * dh] = o_h

    # --- output projection + residual ---
    y = jnp.dot(attn_sc[...].astype(jnp.bfloat16), projw_ref[...],
                preferred_element_type=jnp.float32)
    y = y + projb_ref[...].astype(jnp.float32) + x
    o_ref[0] = y.astype(o_ref.dtype)


def attn_block(tok, blk, *, heads, dim, t_real, eps=1e-6):
    B, T, D = tok.shape
    return pl.pallas_call(
        functools.partial(_attn_block_kernel, heads=heads, dim=dim,
                          t_real=t_real, eps=eps),
        out_shape=jax.ShapeDtypeStruct((B, T, D), tok.dtype),
        grid=(B,),
        in_specs=[
            pl.BlockSpec((1, T, D), lambda b: (b, 0, 0)),
            pl.BlockSpec((1, D), lambda b: (0, 0)),
            pl.BlockSpec((1, D), lambda b: (0, 0)),
            pl.BlockSpec((D, 3 * D), lambda b: (0, 0)),
            pl.BlockSpec((1, 3 * D), lambda b: (0, 0)),
            pl.BlockSpec((D, D), lambda b: (0, 0)),
            pl.BlockSpec((1, D), lambda b: (0, 0)),
        ],
        out_specs=pl.BlockSpec((1, T, D), lambda b: (b, 0, 0)),
        scratch_shapes=[pltpu.VMEM((T, D), jnp.float32)],
        compiler_params=pltpu.CompilerParams(dimension_semantics=("parallel",)),
    )(tok, blk["ln1_g"].reshape(1, D), blk["ln1_b"].reshape(1, D),
      blk["qkv_w"], blk["qkv_b"].reshape(1, 3 * D),
      blk["proj_w"], blk["proj_b"].reshape(1, D))


# ----------------------------------------------------------------------------
# fused MLP sub-block:  x = x + fc2( GELU( LN2(x) @ W1 + b1 ) ) @ ... per row
# tile; the (tm, 4D) hidden activation never leaves VMEM
# ----------------------------------------------------------------------------
def _mlp_block_kernel(x_ref, g_ref, bb_ref, w1_ref, b1_ref, w2_ref, b2_ref,
                      o_ref, *, eps):
    x = x_ref[...].astype(jnp.float32)                       # (tm, D) residual
    mu = jnp.mean(x, axis=-1, keepdims=True)
    var = jnp.mean(jnp.square(x - mu), axis=-1, keepdims=True)
    xn = (x - mu) * jax.lax.rsqrt(var + jnp.float32(eps))
    xn = xn * g_ref[...].astype(jnp.float32) + bb_ref[...].astype(jnp.float32)
    h = jnp.dot(xn.astype(jnp.bfloat16), w1_ref[...],
                preferred_element_type=jnp.float32)
    h = h + b1_ref[...].astype(jnp.float32)
    # exact (erf-based) GELU matching torch.nn.GELU() default, in f32
    h = 0.5 * h * (1.0 + jax.lax.erf(h * jnp.float32(1.0 / math.sqrt(2.0))))
    y = jnp.dot(h.astype(jnp.bfloat16), w2_ref[...],
                preferred_element_type=jnp.float32)
    y = y + b2_ref[...].astype(jnp.float32) + x
    o_ref[...] = y.astype(o_ref.dtype)


def mlp_block(x, blk, *, eps=1e-6):
    M, D = x.shape
    H = blk["fc1_w"].shape[1]
    tm = _row_tile(M)
    return pl.pallas_call(
        functools.partial(_mlp_block_kernel, eps=eps),
        out_shape=jax.ShapeDtypeStruct((M, D), x.dtype),
        grid=(M // tm,),
        in_specs=[
            pl.BlockSpec((tm, D), lambda i: (i, 0)),
            pl.BlockSpec((1, D), lambda i: (0, 0)),
            pl.BlockSpec((1, D), lambda i: (0, 0)),
            pl.BlockSpec((D, H), lambda i: (0, 0)),
            pl.BlockSpec((1, H), lambda i: (0, 0)),
            pl.BlockSpec((H, D), lambda i: (0, 0)),
            pl.BlockSpec((1, D), lambda i: (0, 0)),
        ],
        out_specs=pl.BlockSpec((tm, D), lambda i: (i, 0)),
        compiler_params=pltpu.CompilerParams(dimension_semantics=("parallel",)),
    )(x, blk["ln2_g"].reshape(1, D), blk["ln2_b"].reshape(1, D),
      blk["fc1_w"], blk["fc1_b"].reshape(1, H),
      blk["fc2_w"], blk["fc2_b"].reshape(1, D))


# ----------------------------------------------------------------------------
# Synthetic DINO ViT parameters (deterministic); matmul weights stored in bf16
# with the 1/sqrt(dh) attention scale folded into the q columns of qkv_w/qkv_b
# ----------------------------------------------------------------------------
def init_params(key, *, in_chans, patch, dim, depth, heads, mlp_ratio):
    def nrm(k, shape, std=0.02):
        return std * jax.random.normal(k, shape, dtype=jnp.float32)

    keys = iter(jax.random.split(key, 4 + depth * 4))
    n_patch_feats = in_chans * patch * patch
    hidden = dim * mlp_ratio
    scale = (dim // heads) ** -0.5
    params = {
        # conv [D, C, p, p] flattened as matmul weight [C*p*p, D]
        "patch_w": nrm(next(keys), (n_patch_feats, dim)).astype(jnp.bfloat16),
        "patch_b": jnp.zeros((dim,), jnp.float32),
        "cls_token": nrm(next(keys), (1, 1, dim)),
        "norm_g": jnp.ones((dim,), jnp.float32),
        "norm_b": jnp.zeros((dim,), jnp.float32),
        "blocks": [],
    }
    for _ in range(depth):
        qkv_w = nrm(next(keys), (dim, 3 * dim))
        qkv_b = jnp.zeros((3 * dim,), jnp.float32)
        # fold the attention scale into the q projection (numerically identical,
        # removes a (T, D) f32 multiply per batch per layer)
        qkv_w = qkv_w.at[:, :dim].multiply(scale)
        qkv_b = qkv_b.at[:dim].multiply(scale)
        blk = {
            "ln1_g": jnp.ones((dim,), jnp.float32),
            "ln1_b": jnp.zeros((dim,), jnp.float32),
            "qkv_w": qkv_w.astype(jnp.bfloat16),
            "qkv_b": qkv_b,
            "proj_w": nrm(next(keys), (dim, dim)).astype(jnp.bfloat16),
            "proj_b": jnp.zeros((dim,), jnp.float32),
            "ln2_g": jnp.ones((dim,), jnp.float32),
            "ln2_b": jnp.zeros((dim,), jnp.float32),
            "fc1_w": nrm(next(keys), (dim, hidden)).astype(jnp.bfloat16),
            "fc1_b": jnp.zeros((hidden,), jnp.float32),
            "fc2_w": nrm(next(keys), (hidden, dim)).astype(jnp.bfloat16),
            "fc2_b": jnp.zeros((dim,), jnp.float32),
        }
        params["blocks"].append(blk)
    return params


# ----------------------------------------------------------------------------
# DINO forward (returns CLS feature of size n_outputs = dim)
# ----------------------------------------------------------------------------
def dino_forward(x, params, pos_embed, *, patch, dim, heads):
    B, C, H, W = x.shape
    nh, nw = H // patch, W // patch
    N = nh * nw

    # Patch embedding: Conv2d(C, D, kernel=patch, stride=patch) == matmul on
    # non-overlapping flattened patches.
    # TODO(synk): at real DINO resolution the patch extraction could be folded
    # into the patch-embed kernel's index_map to avoid one image-sized HBM copy.
    patches = (
        x.reshape(B, C, nh, patch, nw, patch)
        .transpose(0, 2, 4, 1, 3, 5)
        .reshape(B * N, C * patch * patch)
    )
    tok = linear(patches, params["patch_w"], params["patch_b"]).reshape(B, N, dim)

    # prepend CLS token, add positional embedding
    # TODO(synk): DINO's interpolate_pos_encoding is identity when the input
    # resolution matches the pos_embed grid; bicubic interpolation is omitted.
    cls = jnp.broadcast_to(params["cls_token"], (B, 1, dim))
    tok = jnp.concatenate([cls, tok], axis=1) + pos_embed    # [B, T, D] f32
    T = N + 1

    # pad the token count to a multiple of 8 so row tiles / sublane layouts
    # stay aligned (real DINO has T=197); padded keys are masked in attention
    # and padded rows never mix into real rows, so they are simply discarded.
    T_pad = ((T + 7) // 8) * 8
    if T_pad != T:
        tok = jnp.pad(tok, ((0, 0), (0, T_pad - T), (0, 0)))

    for blk in params["blocks"]:
        tok = attn_block(tok, blk, heads=heads, dim=dim, t_real=T)
        tok = mlp_block(tok.reshape(B * T_pad, dim), blk).reshape(B, T_pad, dim)

    # final LayerNorm; only the CLS row is returned and LN is per-row, so only
    # the CLS rows are normalized.  Done in plain jnp: a pallas_call over a
    # (B, D) block is pure launch overhead.
    cls_rows = tok[:, 0]                                      # [B, D]
    mu = jnp.mean(cls_rows, axis=-1, keepdims=True)
    var = jnp.mean(jnp.square(cls_rows - mu), axis=-1, keepdims=True)
    out = (cls_rows - mu) * jax.lax.rsqrt(var + jnp.float32(1e-6))
    return out * params["norm_g"] + params["norm_b"]


# ----------------------------------------------------------------------------
if __name__ == "__main__":
    # small but shape-consistent config (real dino_vits16: patch=16, dim=384,
    # depth=12, heads=6 — scaled down; D kept a multiple of 128 so all output
    # stores are lane-dense)
    B, C, IMG = 2, 3, 32
    PATCH, DIM, DEPTH, HEADS, MLP_RATIO = 8, 128, 2, 4, 4

    key = jax.random.PRNGKey(0)
    k_x, k_p, k_pos = jax.random.split(key, 3)

    x = jax.random.normal(k_x, (B, C, IMG, IMG), dtype=jnp.float32)
    params = init_params(
        k_p, in_chans=C, patch=PATCH, dim=DIM, depth=DEPTH, heads=HEADS,
        mlp_ratio=MLP_RATIO,
    )
    n_tokens = (IMG // PATCH) ** 2 + 1
    pos_embed = 0.02 * jax.random.normal(k_pos, (1, n_tokens, DIM), dtype=jnp.float32)

    fwd = jax.jit(functools.partial(dino_forward, patch=PATCH, dim=DIM, heads=HEADS))
    feats = jax.block_until_ready(fwd(x, params, pos_embed))
    assert feats.shape == (B, DIM), feats.shape
    assert bool(jnp.all(jnp.isfinite(feats)))
    print("KERNEL_OK")
</pallas_src>

<mosaic_0001>
module attributes {stable_mosaic.version = 11 : i64} {
  func.func @_linear_kernel(%arg0: i32, %arg1: i32, %arg2: memref<32x192xf32, #tpu.memory_space<vmem>>, %arg3: memref<192x128xbf16, #tpu.memory_space<vmem>>, %arg4: memref<1x128xf32, #tpu.memory_space<vmem>>, %arg5: memref<32x128xf32, #tpu.memory_space<vmem>>) attributes {dimension_semantics = [#tpu.dimension_semantics<parallel>, #tpu.dimension_semantics<parallel>], iteration_bounds = array<i64: 1, 1>, scalar_prefetch = 0 : i64, scratch_operands = 0 : i64, tpu.core_type = #tpu.core_type<tc>, window_params = [{transform_indices = @transform_0, window_bounds = array<i64: 32, 192>}, {transform_indices = @transform_1, window_bounds = array<i64: 192, 128>}, {transform_indices = @transform_2, window_bounds = array<i64: 1, 128>}, {transform_indices = @transform_3, window_bounds = array<i64: 32, 128>}]} {
    %c0 = arith.constant 0 : index
    %c0_0 = arith.constant 0 : index
    %0 = vector.load %arg2[%c0, %c0_0] : memref<32x192xf32, #tpu.memory_space<vmem>>, vector<32x192xf32>
    %1 = arith.truncf %0 : vector<32x192xf32> to vector<32x192xbf16>
    %c0_1 = arith.constant 0 : index
    %c0_2 = arith.constant 0 : index
    %2 = vector.load %arg3[%c0_1, %c0_2] : memref<192x128xbf16, #tpu.memory_space<vmem>>, vector<192x128xbf16>
    %cst = arith.constant dense<0.000000e+00> : vector<32x128xf32>
    %3 = tpu.matmul %1, %2, %cst {dimension_numbers = #tpu.dot_dimension_numbers<[1], [0], [0], [1], [0, 0, 1, 1], [], []>} : vector<32x192xbf16>, vector<192x128xbf16>, vector<32x128xf32> -> vector<32x128xf32>
    %c0_3 = arith.constant 0 : index
    %c0_4 = arith.constant 0 : index
    %4 = vector.load %arg4[%c0_3, %c0_4] : memref<1x128xf32, #tpu.memory_space<vmem>>, vector<1x128xf32>
    %5 = vector.broadcast %4 : vector<1x128xf32> to vector<32x128xf32>
    %6 = arith.addf %3, %5 : vector<32x128xf32>
    %c0_5 = arith.constant 0 : index
    %c0_6 = arith.constant 0 : index
    %7 = vector.load %arg5[%c0_5, %c0_6] : memref<32x128xf32, #tpu.memory_space<vmem>>, vector<32x128xf32>
    tpu.vector_store %arg5[%c0_5, %c0_6], %6 {strides = array<i32>} : memref<32x128xf32, #tpu.memory_space<vmem>>, vector<32x128xf32>,
    return
  }
  func.func @transform_0(%arg0: i32, %arg1: i32) -> (i32, i32) {
    %c0_i32 = arith.constant 0 : i32
    %c0_i32_0 = arith.constant 0 : i32
    return %arg0, %c0_i32 : i32, i32
  }
  func.func @transform_1(%arg0: i32, %arg1: i32) -> (i32, i32) {
    %c0_i32 = arith.constant 0 : i32
    %c0_i32_0 = arith.constant 0 : i32
    return %c0_i32, %arg1 : i32, i32
  }
  func.func @transform_2(%arg0: i32, %arg1: i32) -> (i32, i32) {
    %c0_i32 = arith.constant 0 : i32
    %c0_i32_0 = arith.constant 0 : i32
    return %c0_i32, %arg1 : i32, i32
  }
  func.func @transform_3(%arg0: i32, %arg1: i32) -> (i32, i32) {
    %c0_i32 = arith.constant 0 : i32
    return %arg0, %arg1 : i32, i32
  }
}

module attributes {stable_mosaic.version = 11 : i64} {
  func.func @_mlp_block_kernel(%arg0: i32, %arg1: memref<48x128xf32, #tpu.memory_space<vmem>>, %arg2: memref<1x128xf32, #tpu.memory_space<vmem>>, %arg3: memref<1x128xf32, #tpu.memory_space<vmem>>, %arg4: memref<128x512xbf16, #tpu.memory_space<vmem>>, %arg5: memref<1x512xf32, #tpu.memory_space<vmem>>, %arg6: memref<512x128xbf16, #tpu.memory_space<vmem>>, %arg7: memref<1x128xf32, #tpu.memory_space<vmem>>, %arg8: memref<48x128xf32, #tpu.memory_space<vmem>>) attributes {dimension_semantics = [#tpu.dimension_semantics<parallel>], iteration_bounds = array<i64: 1>, scalar_prefetch = 0 : i64, scratch_operands = 0 : i64, tpu.core_type = #tpu.core_type<tc>, window_params = [{transform_indices = @transform_0, window_bounds = array<i64: 48, 128>}, {pipeline_mode = #tpu.pipeline_mode<synchronous>, transform_indices = @transform_1, window_bounds = array<i64: 1, 128>}, {pipeline_mode = #tpu.pipeline_mode<synchronous>, transform_indices = @transform_2, window_bounds = array<i64: 1, 128>}, {pipeline_mode = #tpu.pipeline_mode<synchronous>, transform_indices = @transform_3, window_bounds = array<i64: 128, 512>}, {pipeline_mode = #tpu.pipeline_mode<synchronous>, transform_indices = @transform_4, window_bounds = array<i64: 1, 512>}, {pipeline_mode = #tpu.pipeline_mode<synchronous>, transform_indices = @transform_5, window_bounds = array<i64: 512, 128>}, {pipeline_mode = #tpu.pipeline_mode<synchronous>, transform_indices = @transform_6, window_bounds = array<i64: 1, 128>}, {transform_indices = @transform_7, window_bounds = array<i64: 48, 128>}]} {
    %c0 = arith.constant 0 : index
    %c0_0 = arith.constant 0 : index
    %0 = vector.load %arg1[%c0, %c0_0] : memref<48x128xf32, #tpu.memory_space<vmem>>, vector<48x128xf32>
    %cst = arith.constant dense<0.000000e+00> : vector<48xf32>
    %1 = vector.multi_reduction <add>, %0, %cst [1] : vector<48x128xf32> to vector<48xf32>
    %2 = vector.shape_cast %1 : vector<48xf32> to vector<48x1xf32>
    %cst_1 = arith.constant 1.280000e+02 : f32
    %3 = vector.broadcast %cst_1 : f32 to vector<48x1xf32>
    %4 = arith.divf %2, %3 : vector<48x1xf32>
    %5 = vector.broadcast %4 : vector<48x1xf32> to vector<48x128xf32>
    %6 = arith.subf %0, %5 : vector<48x128xf32>
    %7 = arith.mulf %6, %6 : vector<48x128xf32>
    %cst_2 = arith.constant dense<0.000000e+00> : vector<48xf32>
    %8 = vector.multi_reduction <add>, %7, %cst_2 [1] : vector<48x128xf32> to vector<48xf32>
    %9 = vector.shape_cast %8 : vector<48xf32> to vector<48x1xf32>
    %cst_3 = arith.constant 1.280000e+02 : f32
    %10 = vector.broadcast %cst_3 : f32 to vector<48x1xf32>
    %11 = arith.divf %9, %10 : vector<48x1xf32>
    %12 = vector.broadcast %4 : vector<48x1xf32> to vector<48x128xf32>
    %13 = arith.subf %0, %12 : vector<48x128xf32>
    %cst_4 = arith.constant 9.99999997E-7 : f32
    %14 = vector.broadcast %cst_4 : f32 to vector<48x1xf32>
    %15 = arith.addf %11, %14 : vector<48x1xf32>
    %16 = math.rsqrt %15 : vector<48x1xf32>
    %17 = vector.broadcast %16 : vector<48x1xf32> to vector<48x128xf32>
    %18 = arith.mulf %13, %17 : vector<48x128xf32>
    %c0_5 = arith.constant 0 : index
    %c0_6 = arith.constant 0 : index
    %19 = vector.load %arg2[%c0_5, %c0_6] : memref<1x128xf32, #tpu.memory_space<vmem>>, vector<1x128xf32>
    %20 = vector.broadcast %19 : vector<1x128xf32> to vector<48x128xf32>
    %21 = arith.mulf %18, %20 : vector<48x128xf32>
    %c0_7 = arith.constant 0 : index
    %c0_8 = arith.constant 0 : index
    %22 = vector.load %arg3[%c0_7, %c0_8] : memref<1x128xf32, #tpu.memory_space<vmem>>, vector<1x128xf32>
    %23 = vector.broadcast %22 : vector<1x128xf32> to vector<48x128xf32>
    %24 = arith.addf %21, %23 : vector<48x128xf32>
    %25 = arith.truncf %24 : vector<48x128xf32> to vector<48x128xbf16>
    %c0_9 = arith.constant 0 : index
    %c0_10 = arith.constant 0 : index
    %26 = vector.load %arg4[%c0_9, %c0_10] : memref<128x512xbf16, #tpu.memory_space<vmem>>, vector<128x512xbf16>
    %cst_11 = arith.constant dense<0.000000e+00> : vector<48x512xf32>
    %27 = tpu.matmul %25, %26, %cst_11 {dimension_numbers = #tpu.dot_dimension_numbers<[1], [0], [0], [1], [0, 0, 1, 1], [], []>} : vector<48x128xbf16>, vector<128x512xbf16>, vector<48x512xf32> -> vector<48x512xf32>
    %c0_12 = arith.constant 0 : index
    %c0_13 = arith.constant 0 : index
    %28 = vector.load %arg5[%c0_12, %c0_13] : memref<1x512xf32, #tpu.memory_space<vmem>>, vector<1x512xf32>
    %29 = vector.broadcast %28 : vector<1x512xf32> to vector<48x512xf32>
    %30 = arith.addf %27, %29 : vector<48x512xf32>
    %cst_14 = arith.constant 5.000000e-01 : f32
    %31 = vector.broadcast %cst_14 : f32 to vector<48x512xf32>
    %32 = arith.mulf %31, %30 : vector<48x512xf32>
    %cst_15 = arith.constant 0.707106769 : f32
    %33 = vector.broadcast %cst_15 : f32 to vector<48x512xf32>
    %34 = arith.mulf %30, %33 : vector<48x512xf32>
    %35 = math.erf %34 : vector<48x512xf32>
    %cst_16 = arith.constant 1.000000e+00 : f32
    %36 = vector.broadcast %cst_16 : f32 to vector<48x512xf32>
    %37 = arith.addf %36, %35 : vector<48x512xf32>
    %38 = arith.mulf %32, %37 : vector<48x512xf32>
    %39 = arith.truncf %38 : vector<48x512xf32> to vector<48x512xbf16>
    %c0_17 = arith.constant 0 : index
    %c0_18 = arith.constant 0 : index
    %40 = vector.load %arg6[%c0_17, %c0_18] : memref<512x128xbf16, #tpu.memory_space<vmem>>, vector<512x128xbf16>
    %cst_19 = arith.constant dense<0.000000e+00> : vector<48x128xf32>
    %41 = tpu.matmul %39, %40, %cst_19 {dimension_numbers = #tpu.dot_dimension_numbers<[1], [0], [0], [1], [0, 0, 1, 1], [], []>} : vector<48x512xbf16>, vector<512x128xbf16>, vector<48x128xf32> -> vector<48x128xf32>
    %c0_20 = arith.constant 0 : index
    %c0_21 = arith.constant 0 : index
    %42 = vector.load %arg7[%c0_20, %c0_21] : memref<1x128xf32, #tpu.memory_space<vmem>>, vector<1x128xf32>
    %43 = vector.broadcast %42 : vector<1x128xf32> to vector<48x128xf32>
    %44 = arith.addf %41, %43 : vector<48x128xf32>
    %45 = arith.addf %44, %0 : vector<48x128xf32>
    %c0_22 = arith.constant 0 : index
    %c0_23 = arith.constant 0 : index
    %46 = vector.load %arg8[%c0_22, %c0_23] : memref<48x128xf32, #tpu.memory_space<vmem>>, vector<48x128xf32>
    tpu.vector_store %arg8[%c0_22, %c0_23], %45 {strides = array<i32>} : memref<48x128xf32, #tpu.memory_space<vmem>>, vector<48x128xf32>,
    return
  }
  func.func @transform_0(%arg0: i32) -> (i32, i32) {
    %c0_i32 = arith.constant 0 : i32
    %c0_i32_0 = arith.constant 0 : i32
    return %arg0, %c0_i32 : i32, i32
  }
  func.func @transform_1(%arg0: i32) -> (i32, i32) {
    %c0_i32 = arith.constant 0 : i32
    %c0_i32_0 = arith.constant 0 : i32
    %c0_i32_1 = arith.constant 0 : i32
    return %c0_i32, %c0_i32_0 : i32, i32
  }
  func.func @transform_2(%arg0: i32) -> (i32, i32) {
    %c0_i32 = arith.constant 0 : i32
    %c0_i32_0 = arith.constant 0 : i32
    %c0_i32_1 = arith.constant 0 : i32
    return %c0_i32, %c0_i32_0 : i32, i32
  }
  func.func @transform_3(%arg0: i32) -> (i32, i32) {
    %c0_i32 = arith.constant 0 : i32
    %c0_i32_0 = arith.constant 0 : i32
    %c0_i32_1 = arith.constant 0 : i32
    return %c0_i32, %c0_i32_0 : i32, i32
  }
  func.func @transform_4(%arg0: i32) -> (i32, i32) {
    %c0_i32 = arith.constant 0 : i32
    %c0_i32_0 = arith.constant 0 : i32
    %c0_i32_1 = arith.constant 0 : i32
    return %c0_i32, %c0_i32_0 : i32, i32
  }
  func.func @transform_5(%arg0: i32) -> (i32, i32) {
    %c0_i32 = arith.constant 0 : i32
    %c0_i32_0 = arith.constant 0 : i32
    %c0_i32_1 = arith.constant 0 : i32
    return %c0_i32, %c0_i32_0 : i32, i32
  }
  func.func @transform_6(%arg0: i32) -> (i32, i32) {
    %c0_i32 = arith.constant 0 : i32
    %c0_i32_0 = arith.constant 0 : i32
    %c0_i32_1 = arith.constant 0 : i32
    return %c0_i32, %c0_i32_0 : i32, i32
  }
  func.func @transform_7(%arg0: i32) -> (i32, i32) {
    %c0_i32 = arith.constant 0 : i32
    %c0_i32_0 = arith.constant 0 : i32
    return %arg0, %c0_i32 : i32, i32
  }
}

module attributes {stable_mosaic.version = 11 : i64} {
  func.func @_attn_block_kernel(%arg0: i32, %arg1: memref<1x24x128xf32, #tpu.memory_space<vmem>>, %arg2: memref<1x128xf32, #tpu.memory_space<vmem>>, %arg3: memref<1x128xf32, #tpu.memory_space<vmem>>, %arg4: memref<128x384xbf16, #tpu.memory_space<vmem>>, %arg5: memref<1x384xf32, #tpu.memory_space<vmem>>, %arg6: memref<128x128xbf16, #tpu.memory_space<vmem>>, %arg7: memref<1x128xf32, #tpu.memory_space<vmem>>, %arg8: memref<1x24x128xf32, #tpu.memory_space<vmem>>, %arg9: memref<24x128xf32, #tpu.memory_space<vmem>>) attributes {dimension_semantics = [#tpu.dimension_semantics<parallel>], iteration_bounds = array<i64: 2>, scalar_prefetch = 0 : i64, scratch_operands = 1 : i64, tpu.core_type = #tpu.core_type<tc>, window_params = [{transform_indices = @transform_0, window_bounds = array<i64: 1, 24, 128>}, {pipeline_mode = #tpu.pipeline_mode<synchronous>, transform_indices = @transform_1, window_bounds = array<i64: 1, 128>}, {pipeline_mode = #tpu.pipeline_mode<synchronous>, transform_indices = @transform_2, window_bounds = array<i64: 1, 128>}, {pipeline_mode = #tpu.pipeline_mode<synchronous>, transform_indices = @transform_3, window_bounds = array<i64: 128, 384>}, {pipeline_mode = #tpu.pipeline_mode<synchronous>, transform_indices = @transform_4, window_bounds = array<i64: 1, 384>}, {pipeline_mode = #tpu.pipeline_mode<synchronous>, transform_indices = @transform_5, window_bounds = array<i64: 128, 128>}, {pipeline_mode = #tpu.pipeline_mode<synchronous>, transform_indices = @transform_6, window_bounds = array<i64: 1, 128>}, {transform_indices = @transform_7, window_bounds = array<i64: 1, 24, 128>}]} {
    %c0 = arith.constant 0 : index
    %c0_0 = arith.constant 0 : index
    %c0_1 = arith.constant 0 : index
    %0 = vector.load %arg1[%c0, %c0_0, %c0_1] : memref<1x24x128xf32, #tpu.memory_space<vmem>>, vector<1x24x128xf32>
    %1 = vector.shape_cast %0 : vector<1x24x128xf32> to vector<24x128xf32>
    %cst = arith.constant dense<0.000000e+00> : vector<24xf32>
    %2 = vector.multi_reduction <add>, %1, %cst [1] : vector<24x128xf32> to vector<24xf32>
    %3 = vector.shape_cast %2 : vector<24xf32> to vector<24x1xf32>
    %cst_2 = arith.constant 1.280000e+02 : f32
    %4 = vector.broadcast %cst_2 : f32 to vector<24x1xf32>
    %5 = arith.divf %3, %4 : vector<24x1xf32>
    %6 = vector.broadcast %5 : vector<24x1xf32> to vector<24x128xf32>
    %7 = arith.subf %1, %6 : vector<24x128xf32>
    %8 = arith.mulf %7, %7 : vector<24x128xf32>
    %cst_3 = arith.constant dense<0.000000e+00> : vector<24xf32>
    %9 = vector.multi_reduction <add>, %8, %cst_3 [1] : vector<24x128xf32> to vector<24xf32>
    %10 = vector.shape_cast %9 : vector<24xf32> to vector<24x1xf32>
    %cst_4 = arith.constant 1.280000e+02 : f32
    %11 = vector.broadcast %cst_4 : f32 to vector<24x1xf32>
    %12 = arith.divf %10, %11 : vector<24x1xf32>
    %13 = vector.broadcast %5 : vector<24x1xf32> to vector<24x128xf32>
    %14 = arith.subf %1, %13 : vector<24x128xf32>
    %cst_5 = arith.constant 9.99999997E-7 : f32
    %15 = vector.broadcast %cst_5 : f32 to vector<24x1xf32>
    %16 = arith.addf %12, %15 : vector<24x1xf32>
    %17 = math.rsqrt %16 : vector<24x1xf32>
    %18 = vector.broadcast %17 : vector<24x1xf32> to vector<24x128xf32>
    %19 = arith.mulf %14, %18 : vector<24x128xf32>
    %c0_6 = arith.constant 0 : index
    %c0_7 = arith.constant 0 : index
    %20 = vector.load %arg2[%c0_6, %c0_7] : memref<1x128xf32, #tpu.memory_space<vmem>>, vector<1x128xf32>
    %21 = vector.broadcast %20 : vector<1x128xf32> to vector<24x128xf32>
    %22 = arith.mulf %19, %21 : vector<24x128xf32>
    %c0_8 = arith.constant 0 : index
    %c0_9 = arith.constant 0 : index
    %23 = vector.load %arg3[%c0_8, %c0_9] : memref<1x128xf32, #tpu.memory_space<vmem>>, vector<1x128xf32>
    %24 = vector.broadcast %23 : vector<1x128xf32> to vector<24x128xf32>
    %25 = arith.addf %22, %24 : vector<24x128xf32>
    %26 = arith.truncf %25 : vector<24x128xf32> to vector<24x128xbf16>
    %c0_10 = arith.constant 0 : index
    %c0_11 = arith.constant 0 : index
    %27 = vector.load %arg4[%c0_10, %c0_11] : memref<128x384xbf16, #tpu.memory_space<vmem>>, vector<128x384xbf16>
    %cst_12 = arith.constant dense<0.000000e+00> : vector<24x384xf32>
    %28 = tpu.matmul %26, %27, %cst_12 {dimension_numbers = #tpu.dot_dimension_numbers<[1], [0], [0], [1], [0, 0, 1, 1], [], []>} : vector<24x128xbf16>, vector<128x384xbf16>, vector<24x384xf32> -> vector<24x384xf32>
    %c0_13 = arith.constant 0 : index
    %c0_14 = arith.constant 0 : index
    %29 = vector.load %arg5[%c0_13, %c0_14] : memref<1x384xf32, #tpu.memory_space<vmem>>, vector<1x384xf32>
    %30 = vector.broadcast %29 : vector<1x384xf32> to vector<24x384xf32>
    %31 = arith.addf %28, %30 : vector<24x384xf32>
    %32 = tpu.iota {dimensions = array<i32: 1>} : vector<1x24xi32>
    %c17_i32 = arith.constant 17 : i32
    %33 = vector.broadcast %c17_i32 : i32 to vector<1x24xi32>
    %34 = arith.cmpi slt, %32, %33 : vector<1x24xi32>
    %35 = vector.extract_strided_slice %31 {offsets = [0, 0], sizes = [24, 32], strides = [1, 1]} : vector<24x384xf32> to vector<24x32xf32>
    %36 = vector.extract_strided_slice %31 {offsets = [0, 128], sizes = [24, 32], strides = [1, 1]} : vector<24x384xf32> to vector<24x32xf32>
    %37 = vector.extract_strided_slice %31 {offsets = [0, 256], sizes = [24, 32], strides = [1, 1]} : vector<24x384xf32> to vector<24x32xf32>
    %38 = arith.truncf %35 : vector<24x32xf32> to vector<24x32xbf16>
    %39 = arith.truncf %36 : vector<24x32xf32> to vector<24x32xbf16>
    %cst_15 = arith.constant dense<0.000000e+00> : vector<24x24xf32>
    %40 = tpu.matmul %38, %39, %cst_15 {dimension_numbers = #tpu.dot_dimension_numbers<[1], [1], [0], [0], [0, 0, 1, 0], [], []>} : vector<24x32xbf16>, vector<24x32xbf16>, vector<24x24xf32> -> vector<24x24xf32>
    %cst_16 = arith.constant 0xFF800000 : f32
    %41 = vector.shape_cast %34 : vector<1x24xi1> to vector<1x24xi1>
    %42 = vector.broadcast %41 : vector<1x24xi1> to vector<24x24xi1>
    %43 = vector.broadcast %cst_16 : f32 to vector<24x24xf32>
    %44 = arith.select %42, %40, %43 : vector<24x24xi1>, vector<24x24xf32>
    %cst_17 = arith.constant dense<0xFF800000> : vector<24xf32>
    %45 = vector.multi_reduction <maximumf>, %44, %cst_17 [1] : vector<24x24xf32> to vector<24xf32>
    %46 = vector.shape_cast %45 : vector<24xf32> to vector<24x1xf32>
    %47 = vector.broadcast %46 : vector<24x1xf32> to vector<24x24xf32>
    %48 = arith.subf %44, %47 : vector<24x24xf32>
    %49 = math.exp %48 : vector<24x24xf32>
    %cst_18 = arith.constant dense<0.000000e+00> : vector<24xf32>
    %50 = vector.multi_reduction <add>, %49, %cst_18 [1] : vector<24x24xf32> to vector<24xf32>
    %51 = vector.shape_cast %50 : vector<24xf32> to vector<24x1xf32>
    %52 = tpu.reciprocal %51 {approx = true} : vector<24x1xf32> -> vector<24x1xf32>
    %53 = vector.broadcast %52 : vector<24x1xf32> to vector<24x24xf32>
    %54 = arith.mulf %49, %53 : vector<24x24xf32>
    %55 = arith.truncf %54 : vector<24x24xf32> to vector<24x24xbf16>
    %56 = arith.truncf %37 : vector<24x32xf32> to vector<24x32xbf16>
    %cst_19 = arith.constant dense<0.000000e+00> : vector<24x32xf32>
    %57 = tpu.matmul %55, %56, %cst_19 {dimension_numbers = #tpu.dot_dimension_numbers<[1], [0], [0], [1], [0, 0, 1, 1], [], []>} : vector<24x24xbf16>, vector<24x32xbf16>, vector<24x32xf32> -> vector<24x32xf32>
    %c0_20 = arith.constant 0 : index
    %c0_21 = arith.constant 0 : index
    %58 = vector.load %arg9[%c0_20, %c0_21] : memref<24x128xf32, #tpu.memory_space<vmem>>, vector<24x32xf32>
    tpu.vector_store %arg9[%c0_20, %c0_21], %57 {strides = array<i32>} : memref<24x128xf32, #tpu.memory_space<vmem>>, vector<24x32xf32>,
    %59 = vector.extract_strided_slice %31 {offsets = [0, 32], sizes = [24, 32], strides = [1, 1]} : vector<24x384xf32> to vector<24x32xf32>
    %60 = vector.extract_strided_slice %31 {offsets = [0, 160], sizes = [24, 32], strides = [1, 1]} : vector<24x384xf32> to vector<24x32xf32>
    %61 = vector.extract_strided_slice %31 {offsets = [0, 288], sizes = [24, 32], strides = [1, 1]} : vector<24x384xf32> to vector<24x32xf32>
    %62 = arith.truncf %59 : vector<24x32xf32> to vector<24x32xbf16>
    %63 = arith.truncf %60 : vector<24x32xf32> to vector<24x32xbf16>
    %cst_22 = arith.constant dense<0.000000e+00> : vector<24x24xf32>
    %64 = tpu.matmul %62, %63, %cst_22 {dimension_numbers = #tpu.dot_dimension_numbers<[1], [1], [0], [0], [0, 0, 1, 0], [], []>} : vector<24x32xbf16>, vector<24x32xbf16>, vector<24x24xf32> -> vector<24x24xf32>
    %cst_23 = arith.constant 0xFF800000 : f32
    %65 = vector.shape_cast %34 : vector<1x24xi1> to vector<1x24xi1>
    %66 = vector.broadcast %65 : vector<1x24xi1> to vector<24x24xi1>
    %67 = vector.broadcast %cst_23 : f32 to vector<24x24xf32>
    %68 = arith.select %66, %64, %67 : vector<24x24xi1>, vector<24x24xf32>
    %cst_24 = arith.constant dense<0xFF800000> : vector<24xf32>
    %69 = vector.multi_reduction <maximumf>, %68, %cst_24 [1] : vector<24x24xf32> to vector<24xf32>
    %70 = vector.shape_cast %69 : vector<24xf32> to vector<24x1xf32>
    %71 = vector.broadcast %70 : vector<24x1xf32> to vector<24x24xf32>
    %72 = arith.subf %68, %71 : vector<24x24xf32>
    %73 = math.exp %72 : vector<24x24xf32>
    %cst_25 = arith.constant dense<0.000000e+00> : vector<24xf32>
    %74 = vector.multi_reduction <add>, %73, %cst_25 [1] : vector<24x24xf32> to vector<24xf32>
    %75 = vector.shape_cast %74 : vector<24xf32> to vector<24x1xf32>
    %76 = tpu.reciprocal %75 {approx = true} : vector<24x1xf32> -> vector<24x1xf32>
    %77 = vector.broadcast %76 : vector<24x1xf32> to vector<24x24xf32>
    %78 = arith.mulf %73, %77 : vector<24x24xf32>
    %79 = arith.truncf %78 : vector<24x24xf32> to vector<24x24xbf16>
    %80 = arith.truncf %61 : vector<24x32xf32> to vector<24x32xbf16>
    %cst_26 = arith.constant dense<0.000000e+00> : vector<24x32xf32>
    %81 = tpu.matmul %79, %80, %cst_26 {dimension_numbers = #tpu.dot_dimension_numbers<[1], [0], [0], [1], [0, 0, 1, 1], [], []>} : vector<24x24xbf16>, vector<24x32xbf16>, vector<24x32xf32> -> vector<24x32xf32>
    %c0_27 = arith.constant 0 : index
    %c32 = arith.constant 32 : index
    %82 = vector.load %arg9[%c0_27, %c32] : memref<24x128xf32, #tpu.memory_space<vmem>>, vector<24x32xf32>
    tpu.vector_store %arg9[%c0_27, %c32], %81 {strides = array<i32>} : memref<24x128xf32, #tpu.memory_space<vmem>>, vector<24x32xf32>,
    %83 = vector.extract_strided_slice %31 {offsets = [0, 64], sizes = [24, 32], strides = [1, 1]} : vector<24x384xf32> to vector<24x32xf32>
    %84 = vector.extract_strided_slice %31 {offsets = [0, 192], sizes = [24, 32], strides = [1, 1]} : vector<24x384xf32> to vector<24x32xf32>
    %85 = vector.extract_strided_slice %31 {offsets = [0, 320], sizes = [24, 32], strides = [1, 1]} : vector<24x384xf32> to vector<24x32xf32>
    %86 = arith.truncf %83 : vector<24x32xf32> to vector<24x32xbf16>
    %87 = arith.truncf %84 : vector<24x32xf32> to vector<24x32xbf16>
    %cst_28 = arith.constant dense<0.000000e+00> : vector<24x24xf32>
    %88 = tpu.matmul %86, %87, %cst_28 {dimension_numbers = #tpu.dot_dimension_numbers<[1], [1], [0], [0], [0, 0, 1, 0], [], []>} : vector<24x32xbf16>, vector<24x32xbf16>, vector<24x24xf32> -> vector<24x24xf32>
    %cst_29 = arith.constant 0xFF800000 : f32
    %89 = vector.shape_cast %34 : vector<1x24xi1> to vector<1x24xi1>
    %90 = vector.broadcast %89 : vector<1x24xi1> to vector<24x24xi1>
    %91 = vector.broadcast %cst_29 : f32 to vector<24x24xf32>
    %92 = arith.select %90, %88, %91 : vector<24x24xi1>, vector<24x24xf32>
    %cst_30 = arith.constant dense<0xFF800000> : vector<24xf32>
    %93 = vector.multi_reduction <maximumf>, %92, %cst_30 [1] : vector<24x24xf32> to vector<24xf32>
    %94 = vector.shape_cast %93 : vector<24xf32> to vector<24x1xf32>
    %95 = vector.broadcast %94 : vector<24x1xf32> to vector<24x24xf32>
    %96 = arith.subf %92, %95 : vector<24x24xf32>
    %97 = math.exp %96 : vector<24x24xf32>
    %cst_31 = arith.constant dense<0.000000e+00> : vector<24xf32>
    %98 = vector.multi_reduction <add>, %97, %cst_31 [1] : vector<24x24xf32> to vector<24xf32>
    %99 = vector.shape_cast %98 : vector<24xf32> to vector<24x1xf32>
    %100 = tpu.reciprocal %99 {approx = true} : vector<24x1xf32> -> vector<24x1xf32>
    %101 = vector.broadcast %100 : vector<24x1xf32> to vector<24x24xf32>
    %102 = arith.mulf %97, %101 : vector<24x24xf32>
    %103 = arith.truncf %102 : vector<24x24xf32> to vector<24x24xbf16>
    %104 = arith.truncf %85 : vector<24x32xf32> to vector<24x32xbf16>
    %cst_32 = arith.constant dense<0.000000e+00> : vector<24x32xf32>
    %105 = tpu.matmul %103, %104, %cst_32 {dimension_numbers = #tpu.dot_dimension_numbers<[1], [0], [0], [1], [0, 0, 1, 1], [], []>} : vector<24x24xbf16>, vector<24x32xbf16>, vector<24x32xf32> -> vector<24x32xf32>
    %c0_33 = arith.constant 0 : index
    %c64 = arith.constant 64 : index
    %106 = vector.load %arg9[%c0_33, %c64] : memref<24x128xf32, #tpu.memory_space<vmem>>, vector<24x32xf32>
    tpu.vector_store %arg9[%c0_33, %c64], %105 {strides = array<i32>} : memref<24x128xf32, #tpu.memory_space<vmem>>, vector<24x32xf32>,
    %107 = vector.extract_strided_slice %31 {offsets = [0, 96], sizes = [24, 32], strides = [1, 1]} : vector<24x384xf32> to vector<24x32xf32>
    %108 = vector.extract_strided_slice %31 {offsets = [0, 224], sizes = [24, 32], strides = [1, 1]} : vector<24x384xf32> to vector<24x32xf32>
    %109 = vector.extract_strided_slice %31 {offsets = [0, 352], sizes = [24, 32], strides = [1, 1]} : vector<24x384xf32> to vector<24x32xf32>
    %110 = arith.truncf %107 : vector<24x32xf32> to vector<24x32xbf16>
    %111 = arith.truncf %108 : vector<24x32xf32> to vector<24x32xbf16>
    %cst_34 = arith.constant dense<0.000000e+00> : vector<24x24xf32>
    %112 = tpu.matmul %110, %111, %cst_34 {dimension_numbers = #tpu.dot_dimension_numbers<[1], [1], [0], [0], [0, 0, 1, 0], [], []>} : vector<24x32xbf16>, vector<24x32xbf16>, vector<24x24xf32> -> vector<24x24xf32>
    %cst_35 = arith.constant 0xFF800000 : f32
    %113 = vector.shape_cast %34 : vector<1x24xi1> to vector<1x24xi1>
    %114 = vector.broadcast %113 : vector<1x24xi1> to vector<24x24xi1>
    %115 = vector.broadcast %cst_35 : f32 to vector<24x24xf32>
    %116 = arith.select %114, %112, %115 : vector<24x24xi1>, vector<24x24xf32>
    %cst_36 = arith.constant dense<0xFF800000> : vector<24xf32>
    %117 = vector.multi_reduction <maximumf>, %116, %cst_36 [1] : vector<24x24xf32> to vector<24xf32>
    %118 = vector.shape_cast %117 : vector<24xf32> to vector<24x1xf32>
    %119 = vector.broadcast %118 : vector<24x1xf32> to vector<24x24xf32>
    %120 = arith.subf %116, %119 : vector<24x24xf32>
    %121 = math.exp %120 : vector<24x24xf32>
    %cst_37 = arith.constant dense<0.000000e+00> : vector<24xf32>
    %122 = vector.multi_reduction <add>, %121, %cst_37 [1] : vector<24x24xf32> to vector<24xf32>
    %123 = vector.shape_cast %122 : vector<24xf32> to vector<24x1xf32>
    %124 = tpu.reciprocal %123 {approx = true} : vector<24x1xf32> -> vector<24x1xf32>
    %125 = vector.broadcast %124 : vector<24x1xf32> to vector<24x24xf32>
    %126 = arith.mulf %121, %125 : vector<24x24xf32>
    %127 = arith.truncf %126 : vector<24x24xf32> to vector<24x24xbf16>
    %128 = arith.truncf %109 : vector<24x32xf32> to vector<24x32xbf16>
    %cst_38 = arith.constant dense<0.000000e+00> : vector<24x32xf32>
    %129 = tpu.matmul %127, %128, %cst_38 {dimension_numbers = #tpu.dot_dimension_numbers<[1], [0], [0], [1], [0, 0, 1, 1], [], []>} : vector<24x24xbf16>, vector<24x32xbf16>, vector<24x32xf32> -> vector<24x32xf32>
    %c0_39 = arith.constant 0 : index
    %c96 = arith.constant 96 : index
    %130 = vector.load %arg9[%c0_39, %c96] : memref<24x128xf32, #tpu.memory_space<vmem>>, vector<24x32xf32>
    tpu.vector_store %arg9[%c0_39, %c96], %129 {strides = array<i32>} : memref<24x128xf32, #tpu.memory_space<vmem>>, vector<24x32xf32>,
    %c0_40 = arith.constant 0 : index
    %c0_41 = arith.constant 0 : index
    %131 = vector.load %arg9[%c0_40, %c0_41] : memref<24x128xf32, #tpu.memory_space<vmem>>, vector<24x128xf32>
    %132 = arith.truncf %131 : vector<24x128xf32> to vector<24x128xbf16>
    %c0_42 = arith.constant 0 : index
    %c0_43 = arith.constant 0 : index
    %133 = vector.load %arg6[%c0_42, %c0_43] : memref<128x128xbf16, #tpu.memory_space<vmem>>, vector<128x128xbf16>
    %cst_44 = arith.constant dense<0.000000e+00> : vector<24x128xf32>
    %134 = tpu.matmul %132, %133, %cst_44 {dimension_numbers = #tpu.dot_dimension_numbers<[1], [0], [0], [1], [0, 0, 1, 1], [], []>} : vector<24x128xbf16>, vector<128x128xbf16>, vector<24x128xf32> -> vector<24x128xf32>
    %c0_45 = arith.constant 0 : index
    %c0_46 = arith.constant 0 : index
    %135 = vector.load %arg7[%c0_45, %c0_46] : memref<1x128xf32, #tpu.memory_space<vmem>>, vector<1x128xf32>
    %136 = vector.broadcast %135 : vector<1x128xf32> to vector<24x128xf32>
    %137 = arith.addf %134, %136 : vector<24x128xf32>
    %138 = arith.addf %137, %1 : vector<24x128xf32>
    %c0_47 = arith.constant 0 : index
    %c0_48 = arith.constant 0 : index
    %c0_49 = arith.constant 0 : index
    %139 = vector.load %arg8[%c0_47, %c0_48, %c0_49] : memref<1x24x128xf32, #tpu.memory_space<vmem>>, vector<1x24x128xf32>
    %140 = vector.shape_cast %139 : vector<1x24x128xf32> to vector<24x128xf32>
    %141 = vector.shape_cast %138 : vector<24x128xf32> to vector<1x24x128xf32>
    tpu.vector_store %arg8[%c0_47, %c0_48, %c0_49], %141 {strides = array<i32>} : memref<1x24x128xf32, #tpu.memory_space<vmem>>, vector<1x24x128xf32>,
    return
  }
  func.func @transform_0(%arg0: i32) -> (i32, i32, i32) {
    %c0_i32 = arith.constant 0 : i32
    %c0_i32_0 = arith.constant 0 : i32
    %c0_i32_1 = arith.constant 0 : i32
    return %arg0, %c0_i32, %c0_i32_0 : i32, i32, i32
  }
  func.func @transform_1(%arg0: i32) -> (i32, i32) {
    %c0_i32 = arith.constant 0 : i32
    %c0_i32_0 = arith.constant 0 : i32
    %c0_i32_1 = arith.constant 0 : i32
    return %c0_i32, %c0_i32_0 : i32, i32
  }
  func.func @transform_2(%arg0: i32) -> (i32, i32) {
    %c0_i32 = arith.constant 0 : i32
    %c0_i32_0 = arith.constant 0 : i32
    %c0_i32_1 = arith.constant 0 : i32
    return %c0_i32, %c0_i32_0 : i32, i32
  }
  func.func @transform_3(%arg0: i32) -> (i32, i32) {
    %c0_i32 = arith.constant 0 : i32
    %c0_i32_0 = arith.constant 0 : i32
    %c0_i32_1 = arith.constant 0 : i32
    return %c0_i32, %c0_i32_0 : i32, i32
  }
  func.func @transform_4(%arg0: i32) -> (i32, i32) {
    %c0_i32 = arith.constant 0 : i32
    %c0_i32_0 = arith.constant 0 : i32
    %c0_i32_1 = arith.constant 0 : i32
    return %c0_i32, %c0_i32_0 : i32, i32
  }
  func.func @transform_5(%arg0: i32) -> (i32, i32) {
    %c0_i32 = arith.constant 0 : i32
    %c0_i32_0 = arith.constant 0 : i32
    %c0_i32_1 = arith.constant 0 : i32
    return %c0_i32, %c0_i32_0 : i32, i32
  }
  func.func @transform_6(%arg0: i32) -> (i32, i32) {
    %c0_i32 = arith.constant 0 : i32
    %c0_i32_0 = arith.constant 0 : i32
    %c0_i32_1 = arith.constant 0 : i32
    return %c0_i32, %c0_i32_0 : i32, i32
  }
  func.func @transform_7(%arg0: i32) -> (i32, i32, i32) {
    %c0_i32 = arith.constant 0 : i32
    %c0_i32_0 = arith.constant 0 : i32
    %c0_i32_1 = arith.constant 0 : i32
    return %arg0, %c0_i32, %c0_i32_0 : i32, i32, i32
  }
}

</mosaic_0001>

<bundles_post_ra>
// kernel: dino_forward.5
= control target key start
LH: loop header
LB: loop body
LE: loop exit
PB: predicated region body
PF: predicated region fallthrough
CT: control target
= control target key end

     0   :  { %v246_v0 = vmov 0   ;;  %vm130_vm0 = vcmask 523264   ;;  %s366_s1 = inlined_call_operand.vmem [shape: bf16[192,128], index: 1, kind: input, shape index: {}]   ;;  %s367_s0 = inlined_call_operand.vmem [shape: f32[32,192], index: 0, kind: input, shape index: {}]   ;;  %s368_s2 = inlined_call_operand.vmem [shape: f32[1,128], index: 2, kind: input, shape index: {}]   ;;  %s369_s3 = inlined_call_operand.vmem [shape: f32[32,128], index: 3, kind: output, shape index: {}]  }
   0x1   :  { %137 = vmatprep.subr.bf16.mxu0 %v246_v0  ;;  %209 = vmatprep.subr.bf16.mxu1 %v246_v0  ;;  %v234_v1 = vld [vmem:[%s366_s1 + $0x38] sm:$0xff]   ;;  %v235_v2 = vld [vmem:[%s366_s1 + $0x30] sm:$0xff]   ;;  %v236_v3 = vld [vmem:[%s366_s1 + $0x28] sm:$0xff]  }
   0x2   :  { %138 = vmatpush1.bf16.msra.mxu0 %v234_v1  ;;  %221 = vmatpush1.bf16.msra.mxu1 %v234_v1  ;;  %v237_v4 = vld [vmem:[%s366_s1 + $0x20] sm:$0xff]   ;;  %v16_v5 = vld [vmem:[%s367_s0 + $0x8] sm:$0xff]  ;;  %v18_v6 = vld [vmem:[%s367_s0 + $0x18] sm:$0xff] }
   0x3   :  { %139 = vmatprep.subr.bf16.mxu0 %v246_v0  ;;  %210 = vmatprep.subr.bf16.mxu1 %v246_v0  ;;  %v20_v7 = vld [vmem:[%s367_s0 + $0x28] sm:$0xff]  ;;  %v24_v8 = vpack.c.bf16 %v18_v6, %v16_v5  ;;  %v22_v9 = vld [vmem:[%s367_s0 + $0x38] sm:$0xff]  ;;  %v239_v12 = vld [vmem:[%s366_s1 + $0x10] sm:$0xff]  }
   0x4   :  { %v238_v10 = vld [vmem:[%s366_s1 + $0x18] sm:$0xff]   ;;  %v26_v11 = vpack.c.bf16 %v22_v9, %v20_v7  ;;  %v240_v13 = vld [vmem:[%s366_s1 + $0x8] sm:$0xff]   ;;  %v241_v14 = vld [vmem:[%s366_s1] sm:$0xff]  }
   0x5   :  { %207 = vmatprep.mubr.msk.bf16.mxu0 %vm130_vm0, %v24_v8  ;;  %v242_v15 = vld [vmem:[%s366_s1 + $0x58] sm:$0xff]   ;;  %v243_v16 = vld [vmem:[%s366_s1 + $0x50] sm:$0xff]   ;;  %v244_v17 = vld [vmem:[%s366_s1 + $0x48] sm:$0xff]  }
   0x6   :  { %140 = vmatpush1.bf16.msra.mxu0 %v235_v2  ;;  %222 = vmatpush1.bf16.msra.mxu1 %v235_v2  ;;  %v245_v18 = vld [vmem:[%s366_s1 + $0x40] sm:$0xff]   ;;  %v17_v20 = vld [vmem:[%s367_s0 + $0x10] sm:$0xff] }
   0x7   :  { %141 = vmatprep.subr.bf16.mxu0 %v246_v0  ;;  %211 = vmatprep.subr.bf16.mxu1 %v246_v0  ;;  %v15_v19 = vld [vmem:[%s367_s0] sm:$0xff]  ;;  %v21_v22 = vld [vmem:[%s367_s0 + $0x30] sm:$0xff] }
   0x8   :  { %208 = vmatprep.mubr.msk.bf16.mxu1 %vm130_vm0, %v26_v11  ;;  %v19_v21 = vld [vmem:[%s367_s0 + $0x20] sm:$0xff]  ;;  %v23_v23 = vpack.c.bf16 %v17_v20, %v15_v19 }
   0x9   :  { %v25_v24 = vpack.c.bf16 %v21_v22, %v19_v21  ;;  %v194_v25 = vld [vmem:[%s368_s2] ss:$0 sm:$0xff] }
   0xa   :  { %142 = vmatpush1.bf16.msra.mxu0 %v236_v3  ;;  %223 = vmatpush1.bf16.msra.mxu1 %v236_v3 }
   0xb   :  { %143 = vmatprep.subr.bf16.mxu0 %v246_v0  ;;  %212 = vmatprep.subr.bf16.mxu1 %v246_v0 }
   0xe   :  { %144 = vmatpush1.bf16.msra.mxu0 %v237_v4  ;;  %224 = vmatpush1.bf16.msra.mxu1 %v237_v4 }
   0xf   :  { %145 = vmatprep.subr.bf16.mxu0 %v246_v0  ;;  %213 = vmatprep.subr.bf16.mxu1 %v246_v0 }
  0x12   :  { %146 = vmatpush1.bf16.msra.mxu0 %v238_v10  ;;  %225 = vmatpush1.bf16.msra.mxu1 %v238_v10 }
  0x13   :  { %147 = vmatprep.subr.bf16.mxu0 %v246_v0  ;;  %214 = vmatprep.subr.bf16.mxu1 %v246_v0 }
  0x16   :  { %148 = vmatpush1.bf16.msra.mxu0 %v239_v12  ;;  %226 = vmatpush1.bf16.msra.mxu1 %v239_v12 }
  0x17   :  { %149 = vmatprep.subr.bf16.mxu0 %v246_v0  ;;  %215 = vmatprep.subr.bf16.mxu1 %v246_v0 }
  0x1a   :  { %150 = vmatpush1.bf16.msra.mxu0 %v240_v13  ;;  %227 = vmatpush1.bf16.msra.mxu1 %v240_v13 }
  0x1b   :  { %151 = vmatprep.subr.bf16.mxu0 %v246_v0  ;;  %216 = vmatprep.subr.bf16.mxu1 %v246_v0 }
  0x1e   :  { %152 = vmatpush1.bf16.msra.mxu0 %v241_v14  ;;  %228 = vmatpush1.bf16.msra.mxu1 %v241_v14 }
  0x1f   :  { %161 = vmatprep.subr.bf16.mxu0 %v246_v0  ;;  %217 = vmatprep.subr.bf16.mxu1 %v246_v0 }
  0x22   :  { %162 = vmatpush2.bf16.msra.mxu0 %v242_v15  ;;  %229 = vmatpush2.bf16.msra.mxu1 %v242_v15 }
  0x23   :  { %163 = vmatprep.subr.bf16.mxu0 %v246_v0  ;;  %218 = vmatprep.subr.bf16.mxu1 %v246_v0 }
  0x26   :  { %164 = vmatpush2.bf16.msra.mxu0 %v243_v16  ;;  %230 = vmatpush2.bf16.msra.mxu1 %v243_v16 }
  0x27   :  { %165 = vmatprep.subr.bf16.mxu0 %v246_v0  ;;  %219 = vmatprep.subr.bf16.mxu1 %v246_v0 }
  0x2a   :  { %166 = vmatpush2.bf16.msra.mxu0 %v244_v17  ;;  %231 = vmatpush2.bf16.msra.mxu1 %v244_v17 }
  0x2b   :  { %167 = vmatprep.subr.bf16.mxu0 %v246_v0  ;;  %220 = vmatprep.subr.bf16.mxu1 %v246_v0 }
  0x2e   :  { %168 = vmatpush2.bf16.msra.mxu0 %v245_v18  ;;  %232 = vmatpush2.bf16.msra.mxu1 %v245_v18 }
  0x31   :  { %170 = vmatmul.mubr.bf16.vlgmr.msra.gmra.mxu0 %v23_v23  ;;  %178 = vmatmul.mubr.bf16.vlgmr.msra.gmra.mxu1 %v25_v24 }
  0xf1   :  { %v171_v26 = vpop.f32.mrf.mxu0  ;;  %v179_v27 = vpop.f32.mrf.mxu1 }
  0xf2   :  { %v172_v28 = vadd.f32 %v194_v25, %v171_v26  ;;  %v180_v29 = vadd.f32 %v194_v25, %v179_v27 }
  0xf3   :  { %v173_v30 = vpop.f32.mrf.mxu0  ;;  %v181_v31 = vpop.f32.mrf.mxu1 }
  0xf4   :  { %186 = vst [vmem:[%s369_s3] sm:$0xff] %v172_v28  ;;  %188 = vst [vmem:[%s369_s3 + $0x10] sm:$0xff] %v180_v29 }
  0xf5   :  { %v174_v32 = vpop.f32.mrf.mxu0  ;;  %v182_v33 = vpop.f32.mrf.mxu1 }
  0xf6   :  { %v175_v34 = vadd.f32 %v194_v25, %v174_v32  ;;  %v183_v35 = vadd.f32 %v194_v25, %v182_v33 }
  0xf7   :  { %v176_v36 = vpop.f32.mrf.mxu0  ;;  %v184_v37 = vpop.f32.mrf.mxu1 }
  0xf8   :  { %187 = vst [vmem:[%s369_s3 + $0x8] sm:$0xff] %v175_v34  ;;  %189 = vst [vmem:[%s369_s3 + $0x18] sm:$0xff] %v183_v35 }

// kernel: dino_forward.7
= control target key start
LH: loop header
LB: loop body
LE: loop exit
PB: predicated region body
PF: predicated region fallthrough
CT: control target
= control target key end

     0   :  { %v1276_v60 = vmov 0   ;;  %s1715_s0 = inlined_call_operand.vmem [shape: f32[48,128], index: 0, kind: input, shape index: {}]   ;;  %s1716_s3 = inlined_call_operand.vmem [shape: bf16[128,512], index: 3, kind: input, shape index: {}]   ;;  %s1717_s1 = inlined_call_operand.vmem [shape: f32[1,128], index: 1, kind: input, shape index: {}]   ;;  %s1718_s2 = inlined_call_operand.vmem [shape: f32[1,128], index: 2, kind: input, shape index: {}]   ;;  %s1719_s5 = inlined_call_operand.vmem [shape: bf16[512,128], index: 5, kind: input, shape index: {}]   ;;  %s1720_s4 = inlined_call_operand.vmem [shape: f32[1,512], index: 4, kind: input, shape index: {}]   ;;  %s1721_s6 = inlined_call_operand.vmem [shape: f32[1,128], index: 6, kind: input, shape index: {}]   ;;  %s1722_s7 = inlined_call_operand.vmem [shape: f32[48,128], index: 7, kind: output, shape index: {}]  }
   0x1   :  { %v27_v0 = vld [vmem:[%s1715_s0] sm:$0xff]  ;;  %v29_v1 = vld [vmem:[%s1715_s0 + $0x10] sm:$0xff]  ;;  %v28_v2 = vld [vmem:[%s1715_s0 + $0x8] sm:$0xff]  ;;  %375 = vmatprep.mubr.bf16.mxu0 %v1276_v60  ;;  %438 = vmatprep.mubr.bf16.mxu1 %v1276_v60 }
   0x2   :  { %33 = vadd.xlane.f32.xlu0 %v27_v0  ;;  %37 = vadd.xlane.f32.xlu1 %v29_v1  ;;  %v30_v3 = vld [vmem:[%s1715_s0 + $0x18] sm:$0xff]  ;;  %v31_v4 = vld [vmem:[%s1715_s0 + $0x20] sm:$0xff]  ;;  %v32_v5 = vld [vmem:[%s1715_s0 + $0x28] sm:$0xff] }
   0x3   :  { %v1130_v6 = vld [vmem:[%s1716_s3 + $0xe4] ss:$16 sps:$4 sm:$0xff]   ;;  %v1132_v7 = vld [vmem:[%s1716_s3 + $0xec] ss:$16 sps:$4 sm:$0xff]   ;;  %v1134_v8 = vld [vmem:[%s1716_s3 + $0xe0] ss:$16 sps:$4 sm:$0xff]  }
   0x4   :  { %343 = vmatprep.subr.bf16.mxu0 %v1130_v6  ;;  %v1135_v9 = vld [vmem:[%s1716_s3 + $0xe8] ss:$16 sps:$4 sm:$0xff]   ;;  %406 = vmatprep.subr.bf16.mxu1 %v1132_v7  ;;  %v1136_v34 = vld [vmem:[%s1716_s3 + $0xc4] ss:$16 sps:$4 sm:$0xff]   ;;  %v1138_v35 = vld [vmem:[%s1716_s3 + $0xcc] ss:$16 sps:$4 sm:$0xff]  }
   0x5   :  { %344 = vmatpush1.bf16.msra.mxu0 %v1134_v8  ;;  %407 = vmatpush1.bf16.msra.mxu1 %v1135_v9  ;;  %v1140_v36 = vld [vmem:[%s1716_s3 + $0xc0] ss:$16 sps:$4 sm:$0xff]   ;;  %v1141_v37 = vld [vmem:[%s1716_s3 + $0xc8] ss:$16 sps:$4 sm:$0xff]   ;;  %v1142_v38 = vld [vmem:[%s1716_s3 + $0xa4] ss:$16 sps:$4 sm:$0xff]  }
   0x6   :  { %35 = vadd.xlane.f32.xlu0 %v28_v2  ;;  %39 = vadd.xlane.f32.xlu1 %v30_v3  ;;  %v1144_v39 = vld [vmem:[%s1716_s3 + $0xac] ss:$16 sps:$4 sm:$0xff]   ;;  %v1146_v40 = vld [vmem:[%s1716_s3 + $0xa0] ss:$16 sps:$4 sm:$0xff]   ;;  %v1147_v41 = vld [vmem:[%s1716_s3 + $0xa8] ss:$16 sps:$4 sm:$0xff]  }
   0x7   :  { %345 = vmatprep.subr.bf16.mxu0 %v1136_v34  ;;  %408 = vmatprep.subr.bf16.mxu1 %v1138_v35  ;;  %v1148_v42 = vld [vmem:[%s1716_s3 + $0x84] ss:$16 sps:$4 sm:$0xff]   ;;  %v1150_v43 = vld [vmem:[%s1716_s3 + $0x8c] ss:$16 sps:$4 sm:$0xff]   ;;  %v1152_v44 = vld [vmem:[%s1716_s3 + $0x80] ss:$16 sps:$4 sm:$0xff]  }
   0x8   :  { %v1153_v45 = vld [vmem:[%s1716_s3 + $0x88] ss:$16 sps:$4 sm:$0xff]   ;;  %v1154_v46 = vld [vmem:[%s1716_s3 + $0x64] ss:$16 sps:$4 sm:$0xff]   ;;  %v1156_v47 = vld [vmem:[%s1716_s3 + $0x6c] ss:$16 sps:$4 sm:$0xff]  }
   0x9   :  { %346 = vmatpush1.bf16.msra.mxu0 %v1140_v36  ;;  %409 = vmatpush1.bf16.msra.mxu1 %v1141_v37  ;;  %v1158_v48 = vld [vmem:[%s1716_s3 + $0x60] ss:$16 sps:$4 sm:$0xff]   ;;  %v1159_v49 = vld [vmem:[%s1716_s3 + $0x68] ss:$16 sps:$4 sm:$0xff]   ;;  %v1160_v50 = vld [vmem:[%s1716_s3 + $0x44] ss:$16 sps:$4 sm:$0xff]  }
   0xa   :  { %41 = vadd.xlane.f32.xlu0 %v31_v4  ;;  %43 = vadd.xlane.f32.xlu1 %v32_v5  ;;  %v1162_v51 = vld [vmem:[%s1716_s3 + $0x4c] ss:$16 sps:$4 sm:$0xff]   ;;  %v1164_v52 = vld [vmem:[%s1716_s3 + $0x40] ss:$16 sps:$4 sm:$0xff]   ;;  %v1165_v53 = vld [vmem:[%s1716_s3 + $0x48] ss:$16 sps:$4 sm:$0xff]  }
   0xb   :  { %347 = vmatprep.subr.bf16.mxu0 %v1142_v38  ;;  %410 = vmatprep.subr.bf16.mxu1 %v1144_v39  ;;  %v1166_v54 = vld [vmem:[%s1716_s3 + $0x24] ss:$16 sps:$4 sm:$0xff]   ;;  %v1168_v55 = vld [vmem:[%s1716_s3 + $0x2c] ss:$16 sps:$4 sm:$0xff]   ;;  %v1170_v56 = vld [vmem:[%s1716_s3 + $0x20] ss:$16 sps:$4 sm:$0xff]  }
   0xc   :  { %v1171_v57 = vld [vmem:[%s1716_s3 + $0x28] ss:$16 sps:$4 sm:$0xff]   ;;  %v1172_v58 = vld [vmem:[%s1716_s3 + $0x4] ss:$16 sps:$4 sm:$0xff]   ;;  %v1174_v59 = vld [vmem:[%s1716_s3 + $0xc] ss:$16 sps:$4 sm:$0xff]  }
   0xd   :  { %348 = vmatpush1.bf16.msra.mxu0 %v1146_v40  ;;  %411 = vmatpush1.bf16.msra.mxu1 %v1147_v41  ;;  %v1176_v61 = vld [vmem:[%s1716_s3] ss:$16 sps:$4 sm:$0xff]   ;;  %v1177_v62 = vld [vmem:[%s1716_s3 + $0x8] ss:$16 sps:$4 sm:$0xff]  }
   0xe   :  { %349 = vmatprep.subr.bf16.mxu0 %v1148_v42  ;;  %412 = vmatprep.subr.bf16.mxu1 %v1150_v43 }
  0x11   :  { %350 = vmatpush1.bf16.msra.mxu0 %v1152_v44  ;;  %413 = vmatpush1.bf16.msra.mxu1 %v1153_v45 }
  0x12   :  { %351 = vmatprep.subr.bf16.mxu0 %v1154_v46  ;;  %414 = vmatprep.subr.bf16.mxu1 %v1156_v47 }
  0x15   :  { %352 = vmatpush1.bf16.msra.mxu0 %v1158_v48  ;;  %415 = vmatpush1.bf16.msra.mxu1 %v1159_v49  ;;  %v1180_v48 = vld [vmem:[%s1719_s5 + $0x38] sm:$0xff]  }
  0x16   :  { %353 = vmatprep.subr.bf16.mxu0 %v1160_v50  ;;  %416 = vmatprep.subr.bf16.mxu1 %v1162_v51  ;;  %v1181_v49 = vld [vmem:[%s1719_s5 + $0xb8] sm:$0xff]   ;;  %v1182_v50 = vld [vmem:[%s1719_s5 + $0x70] sm:$0xff]  }
  0x17   :  { %v1183_v51 = vld [vmem:[%s1719_s5 + $0xf0] sm:$0xff]  }
  0x19   :  { %354 = vmatpush1.bf16.msra.mxu0 %v1164_v52  ;;  %417 = vmatpush1.bf16.msra.mxu1 %v1165_v53  ;;  %v1184_v52 = vld [vmem:[%s1719_s5 + $0x30] sm:$0xff]  }
  0x1a   :  { %355 = vmatprep.subr.bf16.mxu0 %v1166_v54  ;;  %418 = vmatprep.subr.bf16.mxu1 %v1168_v55  ;;  %v1185_v53 = vld [vmem:[%s1719_s5 + $0xb0] sm:$0xff]   ;;  %v1186_v54 = vld [vmem:[%s1719_s5 + $0x68] sm:$0xff]  }
  0x1b   :  { %v1187_v55 = vld [vmem:[%s1719_s5 + $0xe8] sm:$0xff]  }
  0x1d   :  { %356 = vmatpush1.bf16.msra.mxu0 %v1170_v56  ;;  %419 = vmatpush1.bf16.msra.mxu1 %v1171_v57  ;;  %v1188_v56 = vld [vmem:[%s1719_s5 + $0x28] sm:$0xff]  }
  0x1e   :  { %357 = vmatprep.subr.bf16.mxu0 %v1172_v58  ;;  %420 = vmatprep.subr.bf16.mxu1 %v1174_v59  ;;  %v1189_v57 = vld [vmem:[%s1719_s5 + $0xa8] sm:$0xff]   ;;  %v1190_v58 = vld [vmem:[%s1719_s5 + $0x60] sm:$0xff]  }
  0x1f   :  { %v1191_v59 = vld [vmem:[%s1719_s5 + $0xe0] sm:$0xff]  }
  0x21   :  { %358 = vmatpush1.bf16.msra.mxu0 %v1176_v61  ;;  %421 = vmatpush1.bf16.msra.mxu1 %v1177_v62  ;;  %v1193_v61 = vld [vmem:[%s1719_s5 + $0xa0] sm:$0xff]   ;;  %v1194_v62 = vld [vmem:[%s1719_s5 + $0x58] sm:$0xff]  }
  0x8b   :  { %v34_v10 = vpop.xlane.xlu0 %33  ;;  %v38_v11 = vpop.xlane.xlu1 %37 }
  0x8c   :  { %v46_v12 = vmul.f32 0.0078125, %v34_v10  ;;  %v48_v13 = vmul.f32 0.0078125, %v38_v11 }
  0x8e   :  { %v1347_v14 = vsub.f32 %v27_v0, %v46_v12  ;;  %v1349_v15 = vsub.f32 %v29_v1, %v48_v13 }
  0x8f   :  { %v36_v16 = vpop.xlane.xlu0 %35  ;;  %v40_v17 = vpop.xlane.xlu1 %39 }
  0x90   :  { %v47_v18 = vmul.f32 0.0078125, %v36_v16  ;;  %v58_v19 = vmul.f32 %v1347_v14, %v1347_v14  ;;  %v49_v20 = vmul.f32 0.0078125, %v40_v17  ;;  %v60_v23 = vmul.f32 %v1349_v15, %v1349_v15 }
  0x92   :  { %v1353_v21 = vsub.f32 %v28_v2, %v47_v18  ;;  %64 = vadd.xlane.f32.xlu0 %v58_v19  ;;  %v1355_v22 = vsub.f32 %v30_v3, %v49_v20 }
  0x93   :  { %v42_v24 = vpop.xlane.xlu0 %41  ;;  %v44_v25 = vpop.xlane.xlu1 %43 }
  0x94   :  { %v50_v26 = vmul.f32 0.0078125, %v42_v24  ;;  %v59_v27 = vmul.f32 %v1353_v21, %v1353_v21  ;;  %v51_v28 = vmul.f32 0.0078125, %v44_v25  ;;  %v61_v31 = vmul.f32 %v1355_v22, %v1355_v22 }
  0x96   :  { %v1361_v29 = vsub.f32 %v31_v4, %v50_v26  ;;  %68 = vadd.xlane.f32.xlu0 %v60_v23  ;;  %66 = vadd.xlane.f32.xlu1 %v59_v27  ;;  %v1363_v30 = vsub.f32 %v32_v5, %v51_v28  ;;  %v994_v23 = vld [vmem:[%s1717_s1] ss:$0 sm:$0xff] }
  0x97   :  { %v995_v28 = vld [vmem:[%s1718_s2] ss:$0 sm:$0xff] }
  0x98   :  { %v62_v32 = vmul.f32 %v1361_v29, %v1361_v29  ;;  %v63_v33 = vmul.f32 %v1363_v30, %v1363_v30 }
  0x9a   :  { %70 = vadd.xlane.f32.xlu1 %v61_v31  ;;  %72 = vadd.xlane.f32.xlu0 %v62_v32 }
  0x9e   :  { %74 = vadd.xlane.f32.xlu1 %v63_v33 }
 0x11b   :  { %v65_v63 = vpop.xlane.xlu0 %64 }
 0x11c   :  { %v76_v0 = vmul.f32 0.0078125, %v65_v63  ;;  %v1195_v63 = vld [vmem:[%s1719_s5 + $0xd8] sm:$0xff]  }
 0x11e   :  { %v82_v1 = vadd.f32 1e-06, %v76_v0  ;;  %v1196_v0 = vld [vmem:[%s1719_s5 + $0x18] sm:$0xff]  }
 0x11f   :  { %v67_v2 = vpop.xlane.xlu1 %66  ;;  %v69_v3 = vpop.xlane.xlu0 %68 }
 0x120   :  { %1210 = vrsqrt.f32 %v82_v1  ;;  %v77_v4 = vmul.f32 0.0078125, %v67_v2  ;;  %v78_v5 = vmul.f32 0.0078125, %v69_v3  ;;  %v1197_v1 = vld [vmem:[%s1719_s5 + $0x98] sm:$0xff]   ;;  %v1198_v2 = vld [vmem:[%s1719_s5 + $0x50] sm:$0xff]  }
 0x121   :  { %v1199_v3 = vld [vmem:[%s1719_s5 + $0xd0] sm:$0xff]  }
 0x122   :  { %v83_v6 = vadd.f32 1e-06, %v77_v4  ;;  %v84_v7 = vadd.f32 1e-06, %v78_v5  ;;  %v1200_v4 = vld [vmem:[%s1719_s5 + $0x10] sm:$0xff]  }
 0x123   :  { %v71_v8 = vpop.xlane.xlu1 %70  ;;  %v73_v9 = vpop.xlane.xlu0 %72  ;;  %v1201_v5 = vld [vmem:[%s1719_s5 + $0x90] sm:$0xff]  }
 0x124   :  { %1212 = vrsqrt.f32 %v83_v6  ;;  %v79_v10 = vmul.f32 0.0078125, %v71_v8  ;;  %v80_v12 = vmul.f32 0.0078125, %v73_v9  ;;  %v1202_v6 = vld [vmem:[%s1719_s5 + $0x48] sm:$0xff]  }
 0x125   :  { %1214 = vrsqrt.f32 %v84_v7  ;;  %v1203_v7 = vld [vmem:[%s1719_s5 + $0xc8] sm:$0xff]  }
 0x126   :  { %v85_v11 = vadd.f32 1e-06, %v79_v10  ;;  %v86_v17 = vadd.f32 1e-06, %v80_v12  ;;  %v1204_v8 = vld [vmem:[%s1719_s5 + $0x8] sm:$0xff]   ;;  %v1206_v10 = vld [vmem:[%s1719_s5 + $0x40] sm:$0xff]  }
 0x127   :  { %v75_v13 = vpop.xlane.xlu1 %74  ;;  %v1205_v9 = vld [vmem:[%s1719_s5 + $0x88] sm:$0xff]   ;;  %v1208_v12 = vld [vmem:[%s1719_s5] sm:$0xff]  }
 0x128   :  { %1216 = vrsqrt.f32 %v85_v11  ;;  %v81_v16 = vmul.f32 0.0078125, %v75_v13  ;;  %v1207_v11 = vld [vmem:[%s1719_s5 + $0xc0] sm:$0xff]  }
 0x129   :  { %v1209_v13 = vld [vmem:[%s1719_s5 + $0x80] sm:$0xff]  }
 0x12a   :  { %v87_v18 = vadd.f32 1e-06, %v81_v16  ;;  %v163_v16 = vlaneseq }
 0x12c   :  { %1218 = vrsqrt.f32 %v87_v18 }
 0x12d   :  { %v1211_v19 = vpop.eup %1210  ;;  %1220 = vrsqrt.f32 %v86_v17  ;;  %v164_v17 = vshrl.u32 %v163_v16, 7 }
 0x12e   :  { %v94_v20 = vmul.f32 %v1211_v19, %v1347_v14 }
 0x12f   :  { %v165_v18 = vsub.s32 0, %v164_v17  ;;  %v173_v19 = vsub.s32 2, %v164_v17 }
 0x130   :  { %v107_v26 = vmul.f32 %v994_v23, %v94_v20  ;;  %v161_v20 = vld [vmem:[%s1720_s4] sm:$0xf] }
 0x131   :  { %v1213_v24 = vpop.eup %1212 }
 0x132   :  { %v95_v25 = vmul.f32 %v1213_v24, %v1353_v21  ;;  %v1215_v27 = vpop.eup %1214  ;;  %v120_v33 = vadd.f32 %v995_v28, %v107_v26  ;;  %v1572_v24 = vrot.slane %v161_v20, %v165_v18  ;;  %v177_v26 = vsub.s32 3, %v164_v17 }
 0x133   :  { %v96_v35 = vmul.f32 %v1215_v27, %v1349_v15 }
 0x134   :  { %v108_v31 = vmul.f32 %v994_v23, %v95_v25  ;;  %v1574_v25 = vrot.slane %v161_v20, %v173_v19 }
 0x135   :  { %v1217_v32 = vpop.eup %1216  ;;  %v109_v21 = vmul.f32 %v994_v23, %v96_v35  ;;  %v1584_v35 = vrot.slane %v161_v20, %v177_v26 }
 0x136   :  { %v121_v34 = vadd.f32 %v995_v28, %v108_v31  ;;  %v97_v14 = vmul.f32 %v1217_v32, %v1355_v22 }
 0x137   :  { %v122_v42 = vadd.f32 %v995_v28, %v109_v21 }
 0x138   :  { %v126_v36 = vpack.c.bf16 %v121_v34, %v120_v33  ;;  %v110_v37 = vmul.f32 %v994_v23, %v97_v14 }
 0x139   :  { %v1219_v38 = vpop.eup %1218 }
 0x13a   :  { %376 = vmatmul.mubr.bf16.vlgmr.msra.gmra.mxu0 %v126_v36  ;;  %439 = vmatmul.mubr.bf16.vlgmr.msra.gmra.mxu1 %v126_v36  ;;  %v1221_v39 = vpop.eup %1220  ;;  %v123_v40 = vadd.f32 %v995_v28, %v110_v37  ;;  %v99_v41 = vmul.f32 %v1219_v38, %v1363_v30  ;;  %v1178_v30 = vld [vmem:[%s1719_s5 + $0x78] sm:$0xff]  }
 0x13b   :  { %385 = vmatprep.mubr.bf16.mxu0 %v1276_v60  ;;  %448 = vmatprep.mubr.bf16.mxu1 %v1276_v60  ;;  %v98_v43 = vmul.f32 %v1221_v39, %v1361_v29  ;;  %v1179_v29 = vld [vmem:[%s1719_s5 + $0xf8] sm:$0xff]  }
 0x13c   :  { %v127_v15 = vpack.c.bf16 %v123_v40, %v122_v42  ;;  %v112_v44 = vmul.f32 %v994_v23, %v99_v41  ;;  %1061 = vmatprep.subr.bf16.mxu0 %v1178_v30  ;;  %1095 = vmatprep.subr.bf16.mxu1 %v1179_v29 }
 0x13d   :  { %v111_v22 = vmul.f32 %v994_v23, %v98_v43  ;;  %1062 = vmatpush3.bf16.msra.mxu0 %v1180_v48  ;;  %1096 = vmatpush3.bf16.msra.mxu1 %v1181_v49  ;;  %v169_v23 = vsub.s32 1, %v164_v17 }
 0x13e   :  { %v125_v45 = vadd.f32 %v995_v28, %v112_v44  ;;  %1063 = vmatprep.subr.bf16.mxu0 %v1182_v50  ;;  %1097 = vmatprep.subr.bf16.mxu1 %v1183_v51 }
 0x13f   :  { %v124_v46 = vadd.f32 %v995_v28, %v111_v22  ;;  %v1576_v31 = vrot.slane %v161_v20, %v169_v23 }
 0x141   :  { %v128_v47 = vpack.c.bf16 %v125_v45, %v124_v46  ;;  %1064 = vmatpush3.bf16.msra.mxu0 %v1184_v52  ;;  %1098 = vmatpush3.bf16.msra.mxu1 %v1185_v53 }
 0x142   :  { %386 = vmatmul.mubr.bf16.gmra.mxu0 %v127_v15  ;;  %449 = vmatmul.mubr.bf16.gmra.mxu1 %v127_v15 }
 0x143   :  { %395 = vmatprep.mubr.bf16.mxu0 %v1276_v60  ;;  %458 = vmatprep.mubr.bf16.mxu1 %v1276_v60  ;;  %v1192_v60 = vld [vmem:[%s1719_s5 + $0x20] sm:$0xff]  }
 0x144   :  { %1065 = vmatprep.subr.bf16.mxu0 %v1186_v54  ;;  %1099 = vmatprep.subr.bf16.mxu1 %v1187_v55 }
 0x145   :  { %1066 = vmatpush3.bf16.msra.mxu0 %v1188_v56  ;;  %1100 = vmatpush3.bf16.msra.mxu1 %v1189_v57 }
 0x146   :  { %1067 = vmatprep.subr.bf16.mxu0 %v1190_v58  ;;  %1101 = vmatprep.subr.bf16.mxu1 %v1191_v59 }
 0x149   :  { %1068 = vmatpush3.bf16.msra.mxu0 %v1192_v60  ;;  %1102 = vmatpush3.bf16.msra.mxu1 %v1193_v61 }
 0x14a   :  { %396 = vmatmul.mubr.bf16.gmra.mxu0 %v128_v47  ;;  %459 = vmatmul.mubr.bf16.gmra.mxu1 %v128_v47 }
 0x14b   :  { %1069 = vmatprep.subr.bf16.mxu0 %v1194_v62  ;;  %1103 = vmatprep.subr.bf16.mxu1 %v1195_v63 }
 0x14d   :  { %1070 = vmatpush3.bf16.msra.mxu0 %v1196_v0  ;;  %1104 = vmatpush3.bf16.msra.mxu1 %v1197_v1 }
 0x14e   :  { %1071 = vmatprep.subr.bf16.mxu0 %v1198_v2  ;;  %1105 = vmatprep.subr.bf16.mxu1 %v1199_v3 }
 0x151   :  { %1072 = vmatpush3.bf16.msra.mxu0 %v1200_v4  ;;  %1106 = vmatpush3.bf16.msra.mxu1 %v1201_v5 }
 0x152   :  { %1073 = vmatprep.subr.bf16.mxu0 %v1202_v6  ;;  %1107 = vmatprep.subr.bf16.mxu1 %v1203_v7 }
 0x155   :  { %1074 = vmatpush3.bf16.msra.mxu0 %v1204_v8  ;;  %1108 = vmatpush3.bf16.msra.mxu1 %v1205_v9 }
 0x156   :  { %1075 = vmatprep.subr.bf16.mxu0 %v1206_v10  ;;  %1109 = vmatprep.subr.bf16.mxu1 %v1207_v11 }
 0x159   :  { %1076 = vmatpush3.bf16.msra.mxu0 %v1208_v12  ;;  %1110 = vmatpush3.bf16.msra.mxu1 %v1209_v13 }
 0x1fa   :  { %v377_v27 = vpop.f32.mrf.mxu0  ;;  %v440_v28 = vpop.f32.mrf.mxu1 }
 0x1fb   :  { %v1579_v32 = vadd.f32 %v377_v27, %v1572_v24  ;;  %v1582_v33 = vadd.f32 %v440_v28, %v1574_v25 }
 0x1fc   :  { %v379_v34 = vpop.f32.mrf.mxu0  ;;  %v442_v14 = vpop.f32.mrf.mxu1 }
 0x1fd   :  { %v493_v36 = vmul.f32 0.70710677, %v1579_v32  ;;  %v495_v37 = vmul.f32 0.70710677, %v1582_v33  ;;  %v1589_v38 = vadd.f32 %v379_v34, %v1576_v31  ;;  %v443_v43 = vadd.f32 %v442_v14, %v1584_v35 }
 0x1fe   :  { %v381_v21 = vpop.f32.mrf.mxu0  ;;  %v444_v39 = vpop.f32.mrf.mxu1  ;;  %v469_v17 = vmul.f32 0.5, %v1579_v32  ;;  %v471_v20 = vmul.f32 0.5, %v1582_v33 }
 0x1ff   :  { %v1592_v40 = vadd.f32 %v381_v21, %v1572_v24  ;;  %v1595_v41 = vadd.f32 %v444_v39, %v1574_v25  ;;  %v494_v42 = vmul.f32 0.70710677, %v1589_v38  ;;  %1222 = verf.f32 %v493_v36 }
 0x200   :  { %v383_v15 = vpop.f32.mrf.mxu0  ;;  %v446_v44 = vpop.f32.mrf.mxu1  ;;  %1224 = verf.f32 %v495_v37  ;;  %v496_v49 = vmul.f32 0.70710677, %v443_v43  ;;  %v470_v23 = vmul.f32 0.5, %v1589_v38  ;;  %v472_v26 = vmul.f32 0.5, %v443_v43 }
 0x201   :  { %v497_v22 = vmul.f32 0.70710677, %v1592_v40  ;;  %v499_v45 = vmul.f32 0.70710677, %v1595_v41  ;;  %v384_v46 = vadd.f32 %v383_v15, %v1576_v31  ;;  %v1603_v47 = vadd.f32 %v446_v44, %v1584_v35 }
 0x202   :  { %v387_v30 = vpop.f32.mrf.mxu0  ;;  %v450_v29 = vpop.f32.mrf.mxu1  ;;  %1226 = verf.f32 %v494_v42  ;;  %v473_v14 = vmul.f32 0.5, %v1592_v40  ;;  %v475_v21 = vmul.f32 0.5, %v1595_v41 }
 0x203   :  { %v1606_v48 = vadd.f32 %v387_v30, %v1572_v24  ;;  %1228 = verf.f32 %v497_v22  ;;  %v498_v50 = vmul.f32 0.70710677, %v384_v46  ;;  %v500_v53 = vmul.f32 0.70710677, %v1603_v47 }
 0x204   :  { %v389_v51 = vpop.f32.mrf.mxu0  ;;  %v452_v52 = vpop.f32.mrf.mxu1  ;;  %1230 = verf.f32 %v499_v45  ;;  %v1619_v0 = vadd.f32 %v450_v29, %v1574_v25  ;;  %v474_v39 = vmul.f32 0.5, %v384_v46  ;;  %v476_v43 = vmul.f32 0.5, %v1603_v47 }
 0x205   :  { %1232 = verf.f32 %v498_v50  ;;  %v501_v54 = vmul.f32 0.70710677, %v1606_v48  ;;  %v390_v55 = vadd.f32 %v389_v51, %v1576_v31  ;;  %v453_v58 = vadd.f32 %v452_v52, %v1584_v35 }
 0x206   :  { %v391_v56 = vpop.f32.mrf.mxu0  ;;  %v454_v57 = vpop.f32.mrf.mxu1  ;;  %1234 = verf.f32 %v500_v53  ;;  %v503_v9 = vmul.f32 0.70710677, %v1619_v0 }
 0x207   :  { %v1613_v59 = vadd.f32 %v391_v56, %v1572_v24  ;;  %v1616_v60 = vadd.f32 %v454_v57, %v1574_v25  ;;  %1236 = verf.f32 %v496_v49  ;;  %v502_v61 = vmul.f32 0.70710677, %v390_v55 }
 0x208   :  { %v393_v62 = vpop.f32.mrf.mxu0  ;;  %v456_v63 = vpop.f32.mrf.mxu1  ;;  %v504_v1 = vmul.f32 0.70710677, %v453_v58  ;;  %1238 = verf.f32 %v501_v54  ;;  %v478_v45 = vmul.f32 0.5, %v390_v55  ;;  %v480_v30 = vmul.f32 0.5, %v453_v58 }
 0x209   :  { %v505_v2 = vmul.f32 0.70710677, %v1613_v59  ;;  %v507_v3 = vmul.f32 0.70710677, %v1616_v60  ;;  %1240 = verf.f32 %v502_v61  ;;  %v394_v6 = vadd.f32 %v393_v62, %v1576_v31 }
 0x20a   :  { %v397_v4 = vpop.f32.mrf.mxu0  ;;  %v460_v5 = vpop.f32.mrf.mxu1  ;;  %v457_v7 = vadd.f32 %v456_v63, %v1584_v35  ;;  %1242 = verf.f32 %v504_v1 }
 0x20b   :  { %1244 = verf.f32 %v505_v2  ;;  %v506_v10 = vmul.f32 0.70710677, %v394_v6  ;;  %v1628_v18 = vadd.f32 %v397_v4, %v1572_v24  ;;  %v1643_v40 = vadd.f32 %v460_v5, %v1574_v25 }
 0x20c   :  { %v399_v8 = vpop.f32.mrf.mxu0  ;;  %v1223_v11 = vpop.eup %1222  ;;  %1246 = verf.f32 %v507_v3  ;;  %v508_v12 = vmul.f32 0.70710677, %v457_v7  ;;  %v482_v41 = vmul.f32 0.5, %v394_v6  ;;  %v484_v52 = vmul.f32 0.5, %v457_v7 }
 0x20d   :  { %v462_v13 = vpop.f32.mrf.mxu1  ;;  %v1225_v16 = vpop.eup %1224  ;;  %1248 = verf.f32 %v506_v10  ;;  %v541_v34 = vadd.f32 1.0, %v1223_v11  ;;  %v1634_v36 = vadd.f32 %v399_v8, %v1576_v31  ;;  %v509_v15 = vmul.f32 0.70710677, %v1628_v18 }
 0x20e   :  { %1250 = verf.f32 %v508_v12  ;;  %v401_v27 = vpop.f32.mrf.mxu0  ;;  %v543_v37 = vadd.f32 1.0, %v1225_v16  ;;  %v1638_v33 = vadd.f32 %v462_v13, %v1584_v35  ;;  %v511_v55 = vmul.f32 0.70710677, %v1643_v40 }
 0x20f   :  { %v1227_v19 = vpop.eup %1226  ;;  %1252 = verf.f32 %v503_v9  ;;  %v464_v38 = vpop.f32.mrf.mxu1  ;;  %v1646_v44 = vadd.f32 %v401_v27, %v1572_v24  ;;  %v510_v46 = vmul.f32 0.70710677, %v1634_v36  ;;  %v565_v49 = vmul.f32 %v541_v34, %v469_v17 }
 0x210   :  { %v1229_v28 = vpop.eup %1228  ;;  %v403_v47 = vpop.f32.mrf.mxu0  ;;  %v567_v53 = vmul.f32 %v543_v37, %v471_v20  ;;  %v542_v54 = vadd.f32 1.0, %v1227_v19  ;;  %v512_v57 = vmul.f32 0.70710677, %v1638_v33  ;;  %1254 = verf.f32 %v509_v15 }
 0x211   :  { %v1231_v32 = vpop.eup %1230  ;;  %v545_v50 = vadd.f32 1.0, %v1229_v28  ;;  %v466_v61 = vpop.f32.mrf.mxu1  ;;  %v513_v58 = vmul.f32 0.70710677, %v1646_v44  ;;  %1256 = verf.f32 %v510_v46  ;;  %v1653_v2 = vadd.f32 %v464_v38, %v1574_v25 }
 0x212   :  { %v1233_v42 = vpop.eup %1232  ;;  %v547_v62 = vadd.f32 1.0, %v1231_v32  ;;  %v1656_v3 = vadd.f32 %v403_v47, %v1576_v31  ;;  %v1659_v7 = vadd.f32 %v466_v61, %v1584_v35  ;;  %v566_v9 = vmul.f32 %v542_v54, %v470_v23 }
 0x213   :  { %v1235_v22 = vpop.eup %1234  ;;  %v546_v51 = vadd.f32 1.0, %v1233_v42  ;;  %v569_v5 = vmul.f32 %v545_v50, %v473_v14  ;;  %1258 = verf.f32 %v513_v58  ;;  %v515_v11 = vmul.f32 0.70710677, %v1653_v2 }
 0x214   :  { %v1237_v29 = vpop.eup %1236  ;;  %v548_v56 = vadd.f32 1.0, %v1235_v22  ;;  %1260 = verf.f32 %v512_v57  ;;  %v571_v13 = vmul.f32 %v547_v62, %v475_v21  ;;  %v514_v31 = vmul.f32 0.70710677, %v1656_v3 }
 0x215   :  { %v1239_v24 = vpop.eup %1238  ;;  %v544_v1 = vadd.f32 1.0, %v1237_v29  ;;  %v570_v6 = vmul.f32 %v546_v51, %v474_v39  ;;  %1262 = verf.f32 %v511_v55  ;;  %v516_v20 = vmul.f32 0.70710677, %v1659_v7 }
 0x216   :  { %v1241_v63 = vpop.eup %1240  ;;  %v572_v10 = vmul.f32 %v548_v56, %v476_v43  ;;  %1264 = verf.f32 %v515_v11  ;;  %v589_v27 = vpack.c.bf16 %v569_v5, %v565_v49  ;;  %v591_v21 = vpack.c.bf16 %v571_v13, %v567_v53 }
 0x217   :  { %v1243_v4 = vpop.eup %1242  ;;  %v550_v25 = vadd.f32 1.0, %v1241_v63  ;;  %v568_v17 = vmul.f32 %v544_v1, %v472_v26  ;;  %1266 = verf.f32 %v514_v31  ;;  %v590_v23 = vpack.c.bf16 %v570_v6, %v566_v9 }
 0x218   :  { %v1245_v8 = vpop.eup %1244  ;;  %v552_v19 = vadd.f32 1.0, %v1243_v4  ;;  %1268 = verf.f32 %v516_v20  ;;  %v549_v26 = vadd.f32 1.0, %v1239_v24  ;;  %v481_v15 = vmul.f32 0.5, %v1613_v59 }
 0x219   :  { %v1247_v12 = vpop.eup %1246  ;;  %v553_v14 = vadd.f32 1.0, %v1245_v8  ;;  %v592_v37 = vpack.c.bf16 %v572_v10, %v568_v17  ;;  %v574_v39 = vmul.f32 %v550_v25, %v478_v45  ;;  %896 = vmatprep.mubr.bf16.mxu0 %v590_v23  ;;  %v483_v29 = vmul.f32 0.5, %v1616_v60 }
 0x21a   :  { %v1249_v16 = vpop.eup %1248  ;;  %v555_v38 = vadd.f32 1.0, %v1247_v12  ;;  %v576_v43 = vmul.f32 %v552_v19, %v480_v30  ;;  %897 = vmatmul.mubr.bf16.vlgmr.msra.gmra.mxu0 %v589_v27  ;;  %v477_v50 = vmul.f32 0.5, %v1606_v48  ;;  %v479_v45 = vmul.f32 0.5, %v1619_v0 }
 0x21b   :  { %v1251_v35 = vpop.eup %1250  ;;  %v554_v28 = vadd.f32 1.0, %v1249_v16  ;;  %953 = vmatprep.mubr.bf16.mxu1 %v592_v37  ;;  %v577_v51 = vmul.f32 %v553_v14, %v481_v15  ;;  %v485_v48 = vmul.f32 0.5, %v1628_v18  ;;  %v486_v55 = vmul.f32 0.5, %v1634_v36 }
 0x21c   :  { %v1253_v34 = vpop.eup %1252  ;;  %v556_v32 = vadd.f32 1.0, %v1251_v35  ;;  %954 = vmatmul.mubr.bf16.vlgmr.msra.gmra.mxu1 %v591_v21  ;;  %v573_v30 = vmul.f32 %v549_v26, %v477_v50  ;;  %v489_v4 = vmul.f32 0.5, %v1646_v44  ;;  %v491_v9 = vmul.f32 0.5, %v1653_v2 }
 0x21d   :  { %v578_v42 = vmul.f32 %v554_v28, %v482_v41  ;;  %v551_v46 = vadd.f32 1.0, %v1253_v34  ;;  %v579_v41 = vmul.f32 %v555_v38, %v483_v29  ;;  %v1255_v53 = vpop.eup %1254  ;;  %v490_v10 = vmul.f32 0.5, %v1656_v3 }
 0x21e   :  { %v580_v22 = vmul.f32 %v556_v32, %v484_v52  ;;  %v1257_v59 = vpop.eup %1256  ;;  %v593_v56 = vpack.c.bf16 %v577_v51, %v573_v30  ;;  %v557_v63 = vadd.f32 1.0, %v1255_v53  ;;  %v488_v12 = vmul.f32 0.5, %v1638_v33  ;;  %v1271_v30 = vld [vmem:[%s1715_s0 + $0x8] sm:$0xff] }
 0x21f   :  { %v594_v49 = vpack.c.bf16 %v578_v42, %v574_v39  ;;  %v575_v52 = vmul.f32 %v551_v46, %v479_v45  ;;  %v558_v0 = vadd.f32 1.0, %v1257_v59  ;;  %v492_v36 = vmul.f32 0.5, %v1659_v7 }
 0x220   :  { %v596_v47 = vpack.c.bf16 %v580_v22, %v576_v43  ;;  %v1259_v54 = vpop.eup %1258  ;;  %v487_v25 = vmul.f32 0.5, %v1643_v40  ;;  %v581_v44 = vmul.f32 %v557_v63, %v485_v48  ;;  %v1028_v40 = vld [vmem:[%s1721_s6] ss:$0 sm:$0xff] }
 0x221   :  { %904 = vmatprep.mubr.bf16.mxu0 %v594_v49  ;;  %v1261_v57 = vpop.eup %1260  ;;  %v595_v61 = vpack.c.bf16 %v579_v41, %v575_v52  ;;  %v561_v24 = vadd.f32 1.0, %v1259_v54  ;;  %v582_v31 = vmul.f32 %v558_v0, %v486_v55  ;;  %v1270_v22 = vld [vmem:[%s1715_s0] sm:$0xff] }
 0x222   :  { %961 = vmatprep.mubr.bf16.mxu1 %v596_v47  ;;  %v1263_v60 = vpop.eup %1262  ;;  %905 = vmatmul.mubr.bf16.gmra.mxu0 %v593_v56  ;;  %v560_v1 = vadd.f32 1.0, %v1261_v57 }
 0x223   :  { %v1265_v62 = vpop.eup %1264  ;;  %v559_v8 = vadd.f32 1.0, %v1263_v60  ;;  %v585_v18 = vmul.f32 %v561_v24, %v489_v4 }
 0x224   :  { %962 = vmatmul.mubr.bf16.gmra.mxu1 %v595_v61  ;;  %v1267_v58 = vpop.eup %1266  ;;  %v563_v5 = vadd.f32 1.0, %v1265_v62  ;;  %v584_v19 = vmul.f32 %v560_v1, %v488_v12  ;;  %v1272_v62 = vld [vmem:[%s1715_s0 + $0x10] sm:$0xff] }
 0x225   :  { %v1269_v6 = vpop.eup %1268  ;;  %v562_v11 = vadd.f32 1.0, %v1267_v58  ;;  %v583_v35 = vmul.f32 %v559_v8, %v487_v25  ;;  %v597_v28 = vpack.c.bf16 %v585_v18, %v581_v44 }
 0x226   :  { %v564_v13 = vadd.f32 1.0, %v1269_v6  ;;  %v587_v16 = vmul.f32 %v563_v5, %v491_v9  ;;  %v1273_v5 = vld [vmem:[%s1715_s0 + $0x18] sm:$0xff] }
 0x227   :  { %v586_v17 = vmul.f32 %v562_v11, %v490_v10 }
 0x228   :  { %v588_v20 = vmul.f32 %v564_v13, %v492_v36  ;;  %v599_v3 = vpack.c.bf16 %v587_v16, %v583_v35  ;;  %v1274_v16 = vld [vmem:[%s1715_s0 + $0x20] sm:$0xff]  ;;  %v1275_v35 = vld [vmem:[%s1715_s0 + $0x28] sm:$0xff] }
 0x229   :  { %v598_v27 = vpack.c.bf16 %v586_v17, %v582_v31 }
 0x22a   :  { %v600_v2 = vpack.c.bf16 %v588_v20, %v584_v19 }
 0x22b   :  { %912 = vmatprep.mubr.bf16.mxu0 %v598_v27 }
 0x22c   :  { %969 = vmatprep.mubr.bf16.mxu1 %v600_v2  ;;  %913 = vmatmul.mubr.bf16.gmra.mxu0 %v597_v28 }
 0x22d   :  { %970 = vmatmul.mubr.bf16.gmra.mxu1 %v599_v3 }
 0x2da   :  { %v1077_v33 = vpop.f32.mrf.mxu0 }
 0x2dc   :  { %v1111_v7 = vpop.f32.mrf.mxu1  ;;  %v1078_v23 = vpop.f32.mrf.mxu0 }
 0x2dd   :  { %v1079_v34 = vadd.f32 %v1078_v23, %v1077_v33 }
 0x2de   :  { %v1112_v14 = vpop.f32.mrf.mxu1  ;;  %v1080_v32 = vpop.f32.mrf.mxu0 }
 0x2df   :  { %v899_v37 = vadd.f32 %v1079_v34, %v1028_v40  ;;  %v1113_v21 = vadd.f32 %v1112_v14, %v1111_v7 }
 0x2e0   :  { %v1114_v39 = vpop.f32.mrf.mxu1  ;;  %v1081_v38 = vpop.f32.mrf.mxu0 }
 0x2e1   :  { %v956_v42 = vadd.f32 %v1113_v21, %v899_v37  ;;  %v1082_v26 = vadd.f32 %v1081_v38, %v1080_v32 }
 0x2e2   :  { %v1115_v43 = vpop.f32.mrf.mxu1  ;;  %v1083_v15 = vpop.f32.mrf.mxu0 }
 0x2e3   :  { %v978_v46 = vadd.f32 %v1270_v22, %v956_v42  ;;  %v902_v29 = vadd.f32 %v1082_v26, %v1028_v40  ;;  %v1116_v49 = vadd.f32 %v1115_v43, %v1114_v39 }
 0x2e4   :  { %v1117_v50 = vpop.f32.mrf.mxu1  ;;  %v1084_v51 = vpop.f32.mrf.mxu0 }
 0x2e5   :  { %984 = vst [vmem:[%s1722_s7] sm:$0xff] %v978_v46  ;;  %v959_v47 = vadd.f32 %v1116_v49, %v902_v29  ;;  %v1085_v45 = vadd.f32 %v1084_v51, %v1083_v15 }
 0x2e6   :  { %v1118_v41 = vpop.f32.mrf.mxu1  ;;  %v1086_v53 = vpop.f32.mrf.mxu0 }
 0x2e7   :  { %v979_v59 = vadd.f32 %v1271_v30, %v959_v47  ;;  %v907_v52 = vadd.f32 %v1085_v45, %v1028_v40  ;;  %v1119_v54 = vadd.f32 %v1118_v41, %v1117_v50 }
 0x2e8   :  { %v1120_v56 = vpop.f32.mrf.mxu1  ;;  %v1087_v57 = vpop.f32.mrf.mxu0 }
 0x2e9   :  { %985 = vst [vmem:[%s1722_s7 + $0x8] sm:$0xff] %v979_v59  ;;  %v964_v61 = vadd.f32 %v1119_v54, %v907_v52  ;;  %v1088_v60 = vadd.f32 %v1087_v57, %v1086_v53 }
 0x2ea   :  { %v1121_v24 = vpop.f32.mrf.mxu1 }
 0x2eb   :  { %v980_v48 = vadd.f32 %v1272_v62, %v964_v61  ;;  %v910_v55 = vadd.f32 %v1088_v60, %v1028_v40  ;;  %v1122_v0 = vadd.f32 %v1121_v24, %v1120_v56 }
 0x2ec   :  { %v1089_v58 = vpop.f32.mrf.mxu0 }
 0x2ed   :  { %986 = vst [vmem:[%s1722_s7 + $0x10] sm:$0xff] %v980_v48  ;;  %v967_v63 = vadd.f32 %v1122_v0, %v910_v55  ;;  %v1123_v1 = vpop.f32.mrf.mxu1 }
 0x2ee   :  { %v1090_v4 = vpop.f32.mrf.mxu0 }
 0x2ef   :  { %v981_v6 = vadd.f32 %v1273_v5, %v967_v63  ;;  %v1091_v8 = vadd.f32 %v1090_v4, %v1089_v58  ;;  %v1124_v9 = vpop.f32.mrf.mxu1 }
 0x2f0   :  { %v1092_v10 = vpop.f32.mrf.mxu0  ;;  %v1125_v12 = vadd.f32 %v1124_v9, %v1123_v1 }
 0x2f1   :  { %987 = vst [vmem:[%s1722_s7 + $0x18] sm:$0xff] %v981_v6  ;;  %v915_v11 = vadd.f32 %v1091_v8, %v1028_v40  ;;  %v1126_v18 = vpop.f32.mrf.mxu1 }
 0x2f2   :  { %v1093_v36 = vpop.f32.mrf.mxu0 }
 0x2f3   :  { %v972_v13 = vadd.f32 %v1125_v12, %v915_v11  ;;  %v1094_v25 = vadd.f32 %v1093_v36, %v1092_v10  ;;  %v1127_v31 = vpop.f32.mrf.mxu1 }
 0x2f4   :  { %v1128_v19 = vadd.f32 %v1127_v31, %v1126_v18 }
 0x2f5   :  { %v982_v17 = vadd.f32 %v1274_v16, %v972_v13  ;;  %v918_v44 = vadd.f32 %v1094_v25, %v1028_v40 }
 0x2f7   :  { %988 = vst [vmem:[%s1722_s7 + $0x20] sm:$0xff] %v982_v17  ;;  %v975_v20 = vadd.f32 %v1128_v19, %v918_v44 }
 0x2f9   :  { %v983_v27 = vadd.f32 %v1275_v35, %v975_v20 }
 0x2fb   :  { %989 = vst [vmem:[%s1722_s7 + $0x28] sm:$0xff] %v983_v27 }

// kernel: dino_forward.6
= control target key start
LH: loop header
LB: loop body
LE: loop exit
PB: predicated region body
PF: predicated region fallthrough
CT: control target
= control target key end

     0   :  { %s1920_s24 = smov 0   ;;  %s2245_s0 = inlined_call_operand.vmem [shape: f32[2,24,128], index: 0, kind: input, shape index: {}]   ;;  %s2246_s1 = inlined_call_operand.vmem [shape: f32[1,128], index: 1, kind: input, shape index: {}]   ;;  %s2247_s2 = inlined_call_operand.vmem [shape: f32[1,128], index: 2, kind: input, shape index: {}]   ;;  %s2248_s3 = inlined_call_operand.vmem [shape: bf16[128,384], index: 3, kind: input, shape index: {}]   ;;  %s2249_s4 = inlined_call_operand.vmem [shape: f32[1,384], index: 4, kind: input, shape index: {}]   ;;  %s2250_s5 = inlined_call_operand.vmem [shape: bf16[128,128], index: 5, kind: input, shape index: {}]   ;;  %s2251_s6 = inlined_call_operand.vmem [shape: f32[1,128], index: 6, kind: input, shape index: {}]   ;;  %s2252_s7 = inlined_call_operand.vmem [shape: f32[2,24,128], index: 7, kind: output, shape index: {}]  }
   0x1 LB: > { %s1530_s25 = sadd.s32 4294967295, %s1874_s24   ;;  %p1534_p0 = scmp.ge.s32.totalorder %s1874_s24, 1  ;;  %s1874_s24 = sphi %s1920_s24, %s17_s24  }
   0x2   : > { %p237_p1 = scmp.lt.s32.totalorder %s1874_s24, 3 }
   0x4   : > { %p238_p2 = pnand %p1534_p0, %p237_p1 }
   0x5   : > { %p269_p3 = scmp.lt.s32.totalorder (!%p238_p2), %s1530_s25, 1  ;;  %s1877_s23 = smov (!%p238_p2), 96  }
   0x6   : > { %241 = sbr.rel (%p238_p2) target bundleno = 2681 (0xa79), region = 48  ;;  %s1878_s27 = smov (!%p238_p2), 64  }
   0x7   : > { %s1879_s28 = smov (!%p238_p2), 32  }
   0xb   : > { %s2254_s25 = smov (!%p269_p3, %s1530_s25), 1  ;;  %v1771_v3 = vld [vmem:[%s2248_s3 + $0xac] ss:$12 sps:$4 sm:$0xff]   ;;  %v1773_v4 = vld [vmem:[%s2248_s3 + $0xa8] ss:$12 sps:$4 sm:$0xff]   ;;  %v1876_v32 = vmov 0  }
   0xc   : > { %s1758_s26 = smul.u32 24, %s2254_s25  ;;  %v1774_v5 = vld [vmem:[%s2248_s3 + $0xb0] ss:$12 sps:$4 sm:$0xff]   ;;  %516 = vmatprep.subr.bf16.mxu0 %v1771_v3  ;;  %v1775_v18 = vld [vmem:[%s2248_s3 + $0x94] ss:$12 sps:$4 sm:$0xff]   ;;  %548 = vmatprep.mubr.bf16.mxu0 %v1876_v32  ;;  %vm732_vm0 = vcmask 1043456  }
   0xd   : > { %1642 = vmatprep.subr.bf16.mxu1 %v1774_v5  ;;  %517 = vmatpush1.bf16.msra.mxu0 %v1773_v4  ;;  %v1777_v19 = vld [vmem:[%s2248_s3 + $0x90] ss:$12 sps:$4 sm:$0xff]   ;;  %v1778_v20 = vld [vmem:[%s2248_s3 + $0x98] ss:$12 sps:$4 sm:$0xff]   ;;  %v1782_v23 = vld [vmem:[%s2248_s3 + $0x80] ss:$12 sps:$4 sm:$0xff]  }
   0xe   : > { %s1936_s29 = scalar_lea.vmem %s2245_s0, %s1758_s26  ;;  %1643 = vmatpush3.bf16.msra.mxu1 %v1774_v5  ;;  %518 = vmatprep.subr.bf16.mxu0 %v1775_v18  ;;  %v1779_v21 = vld [vmem:[%s2248_s3 + $0x7c] ss:$12 sps:$4 sm:$0xff]   ;;  %v1781_v22 = vld [vmem:[%s2248_s3 + $0x78] ss:$12 sps:$4 sm:$0xff]   ;;  %v1785_v25 = vld [vmem:[%s2248_s3 + $0x60] ss:$12 sps:$4 sm:$0xff]   ;;  %s278_s8 = scalar_lea.vmem %s2252_s7, %s1758_s26 }
   0xf   : > { %v280_v0 = vld [vmem:[%s1936_s29] sm:$0xff]  ;;  %v282_v1 = vld [vmem:[%s1936_s29 + $0x10] sm:$0xff]  ;;  %v281_v2 = vld [vmem:[%s1936_s29 + $0x8] sm:$0xff]  ;;  %1644 = vmatprep.subr.bf16.mxu1 %v1778_v20  ;;  %vm622_vm1 = vcmask 261120   ;;  %vm688_vm3 = vcmask 195584   ;;  %vm973_vm4 = vcmask 523520  }
  0x10   : > { %283 = vadd.xlane.f32.xlu0 %v280_v0  ;;  %287 = vadd.xlane.f32.xlu1 %v282_v1  ;;  %v1783_v24 = vld [vmem:[%s2248_s3 + $0x64] ss:$12 sps:$4 sm:$0xff]   ;;  %v1786_v26 = vld [vmem:[%s2248_s3 + $0x68] ss:$12 sps:$4 sm:$0xff]   ;;  %v1787_v27 = vld [vmem:[%s2248_s3 + $0x4c] ss:$12 sps:$4 sm:$0xff]  }
  0x11   : > { %519 = vmatpush1.bf16.msra.mxu0 %v1777_v19  ;;  %v1790_v28 = vld [vmem:[%s2248_s3 + $0x50] ss:$12 sps:$4 sm:$0xff]   ;;  %v1789_v29 = vld [vmem:[%s2248_s3 + $0x48] ss:$12 sps:$4 sm:$0xff]   ;;  %v1794_v31 = vld [vmem:[%s2248_s3 + $0x38] ss:$12 sps:$4 sm:$0xff]  }
  0x12   : > { %1645 = vmatpush3.bf16.msra.mxu1 %v1778_v20  ;;  %520 = vmatprep.subr.bf16.mxu0 %v1779_v21  ;;  %v1791_v30 = vld [vmem:[%s2248_s3 + $0x34] ss:$12 sps:$4 sm:$0xff]   ;;  %v1793_v33 = vld [vmem:[%s2248_s3 + $0x30] ss:$12 sps:$4 sm:$0xff]   ;;  %v1797_v36 = vld [vmem:[%s2248_s3 + $0x18] ss:$12 sps:$4 sm:$0xff]  }
  0x13   : > { %1646 = vmatprep.subr.bf16.mxu1 %v1782_v23  ;;  %v1795_v34 = vld [vmem:[%s2248_s3 + $0x1c] ss:$12 sps:$4 sm:$0xff]   ;;  %v1798_v35 = vld [vmem:[%s2248_s3 + $0x20] ss:$12 sps:$4 sm:$0xff]   ;;  %v1799_v37 = vld [vmem:[%s2248_s3 + $0x4] ss:$12 sps:$4 sm:$0xff]  }
  0x14   : > { %285 = vadd.xlane.f32.xlu0 %v281_v2  ;;  %v1802_v38 = vld [vmem:[%s2248_s3 + $0x8] ss:$12 sps:$4 sm:$0xff]   ;;  %v1801_v39 = vld [vmem:[%s2248_s3] ss:$12 sps:$4 sm:$0xff]   ;;  %vm1157_vm5 = vcmask 785920   ;;  %vm1341_vm6 = vcmask 1048320  }
  0x15   : > { %521 = vmatpush1.bf16.msra.mxu0 %v1781_v22  ;;  %v1537_v51 = vld [vmem:[%s2246_s1] ss:$0 sm:$0xff] }
  0x16   : > { %1647 = vmatpush3.bf16.msra.mxu1 %v1782_v23  ;;  %522 = vmatprep.subr.bf16.mxu0 %v1783_v24  ;;  %v1538_v57 = vld [vmem:[%s2247_s2] ss:$0 sm:$0xff] }
  0x17   : > { %1648 = vmatprep.subr.bf16.mxu1 %v1786_v26  ;;  %v371_v4 = vld [vmem:[%s2249_s4] sm:$0x7] }
  0x19   : > { %523 = vmatpush1.bf16.msra.mxu0 %v1785_v25 }
  0x1a   : > { %1649 = vmatpush3.bf16.msra.mxu1 %v1786_v26  ;;  %524 = vmatprep.subr.bf16.mxu0 %v1787_v27 }
  0x1b   : > { %1650 = vmatprep.subr.bf16.mxu1 %v1790_v28 }
  0x1d   : > { %525 = vmatpush1.bf16.msra.mxu0 %v1789_v29 }
  0x1e   : > { %1651 = vmatpush3.bf16.msra.mxu1 %v1790_v28  ;;  %526 = vmatprep.subr.bf16.mxu0 %v1791_v30 }
  0x1f   : > { %1652 = vmatprep.subr.bf16.mxu1 %v1794_v31 }
  0x21   : > { %527 = vmatpush1.bf16.msra.mxu0 %v1793_v33 }
  0x22   : > { %1653 = vmatpush3.bf16.msra.mxu1 %v1794_v31  ;;  %528 = vmatprep.subr.bf16.mxu0 %v1795_v34 }
  0x23   : > { %1654 = vmatprep.subr.bf16.mxu1 %v1798_v35 }
  0x25   : > { %529 = vmatpush1.bf16.msra.mxu0 %v1797_v36 }
  0x26   : > { %1655 = vmatpush3.bf16.msra.mxu1 %v1798_v35  ;;  %530 = vmatprep.subr.bf16.mxu0 %v1799_v37 }
  0x27   : > { %1656 = vmatprep.subr.bf16.mxu1 %v1802_v38 }
  0x29   : > { %531 = vmatpush1.bf16.msra.mxu0 %v1801_v39 }
  0x2a   : > { %1657 = vmatpush3.bf16.msra.mxu1 %v1802_v38 }
  0x99   : > { %v284_v6 = vpop.xlane.xlu0 %283  ;;  %v288_v7 = vpop.xlane.xlu1 %287 }
  0x9a   : > { %v290_v8 = vmul.f32 0.0078125, %v284_v6  ;;  %v292_v9 = vmul.f32 0.0078125, %v288_v7 }
  0x9c   : > { %v1950_v10 = vsub.f32 %v280_v0, %v290_v8  ;;  %v1952_v11 = vsub.f32 %v282_v1, %v292_v9  ;;  %v373_v1 = vlaneseq }
  0x9d   : > { %v286_v12 = vpop.xlane.xlu0 %285 }
  0x9e   : > { %v291_v13 = vmul.f32 0.0078125, %v286_v12  ;;  %v296_v14 = vmul.f32 %v1950_v10, %v1950_v10  ;;  %v298_v16 = vmul.f32 %v1952_v11, %v1952_v11 }
  0xa0   : > { %v1956_v15 = vsub.f32 %v281_v2, %v291_v13  ;;  %299 = vadd.xlane.f32.xlu1 %v296_v14  ;;  %v374_v2 = vshrl.u32 %v373_v1, 7 }
  0xa2   : > { %v297_v17 = vmul.f32 %v1956_v15, %v1956_v15  ;;  %v383_v3 = vsub.s32 2, %v374_v2  ;;  %v375_v5 = vsub.s32 0, %v374_v2 }
  0xa4   : > { %303 = vadd.xlane.f32.xlu1 %v298_v16  ;;  %301 = vadd.xlane.f32.xlu0 %v297_v17  ;;  %v384_v6 = vrot.slane %v371_v4, %v383_v3  ;;  %v376_v8 = vrot.slane %v371_v4, %v375_v5  ;;  %v379_v16 = vsub.s32 1, %v374_v2 }
  0xa6   : > { %v380_v26 = vrot.slane %v371_v4, %v379_v16 }
 0x129   : > { %v300_v40 = vpop.xlane.xlu1 %299 }
 0x12a   : > { %v305_v41 = vmul.f32 0.0078125, %v300_v40  ;;  %v2067_v40 = vand.u32 127, %v373_v1 }
 0x12c   : > { %v308_v42 = vadd.f32 1e-06, %v305_v41  ;;  %vm617_vm2 = vcmp.lt.s32.totalorder %v2067_v40, 17 }
 0x12d   : > { %v304_v43 = vpop.xlane.xlu1 %303  ;;  %v302_v44 = vpop.xlane.xlu0 %301 }
 0x12e   : > { %1811 = vrsqrt.f32 %v308_v42  ;;  %v307_v45 = vmul.f32 0.0078125, %v304_v43  ;;  %v306_v46 = vmul.f32 0.0078125, %v302_v44 }
 0x130   : > { %v310_v47 = vadd.f32 1e-06, %v307_v45  ;;  %v309_v48 = vadd.f32 1e-06, %v306_v46 }
 0x132   : > { %1813 = vrsqrt.f32 %v310_v47 }
 0x133   : > { %1815 = vrsqrt.f32 %v309_v48 }
 0x13b   : > { %v1812_v49 = vpop.eup %1811 }
 0x13c   : > { %v314_v50 = vmul.f32 %v1812_v49, %v1950_v10 }
 0x13e   : > { %v324_v56 = vmul.f32 %v1537_v51, %v314_v50 }
 0x13f   : > { %v1814_v52 = vpop.eup %1813 }
 0x140   : > { %v1816_v53 = vpop.eup %1815  ;;  %v316_v54 = vmul.f32 %v1814_v52, %v1952_v11  ;;  %v334_v61 = vadd.f32 %v1538_v57, %v324_v56 }
 0x141   : > { %v315_v55 = vmul.f32 %v1816_v53, %v1956_v15 }
 0x142   : > { %v326_v58 = vmul.f32 %v1537_v51, %v316_v54 }
 0x143   : > { %v325_v59 = vmul.f32 %v1537_v51, %v315_v55 }
 0x144   : > { %v336_v60 = vadd.f32 %v1538_v57, %v326_v58 }
 0x145   : > { %v335_v62 = vadd.f32 %v1538_v57, %v325_v59 }
 0x146   : > { %v338_v63 = vpack.c.bf16 %v336_v60, %v336_v60 }
 0x147   : > { %v337_v0 = vpack.c.bf16 %v335_v62, %v334_v61 }
 0x149   : > { %549 = vmatmul.mubr.bf16.vlgmr.msra.gmra.mxu0 %v337_v0  ;;  %1658 = vmatprep.mubr.bf16.mxu1 %v337_v0 }
 0x14a   : > { %1659 = vmatmul.mubr.bf16.vlgmr.msra.gmra.mxu1 %v338_v63  ;;  %558 = vmatprep.mubr.bf16.mxu0 %v1876_v32 }
 0x151   : > { %559 = vmatmul.mubr.bf16.gmra.mxu0 %v338_v63 }
 0x209   : > { %v550_v7 = vpop.f32.mrf.mxu0 }
 0x20a   : > { %v1660_v9 = vpop.f32.mrf.mxu1  ;;  %v551_v15 = vadd.f32 %v550_v7, %v376_v8 }
 0x20b   : > { %v610_v10 = vadd.f32 %v1660_v9, %v384_v6  ;;  %v552_v11 = vpop.f32.mrf.mxu0 }
 0x20c   : > { %v601_v12 = vpop.f32.mrf.mxu1  ;;  %v553_v32 = vadd.f32 %v552_v11, %v380_v26 }
 0x20d   : > { %v2037_v13 = vpack.c.bf16 %v610_v10, %v610_v10  ;;  %v554_v14 = vpop.f32.mrf.mxu0  ;;  %v602_v23 = vadd.f32 %v601_v12, %v384_v6 }
 0x20e   : > { %v555_v17 = vadd.f32 %v554_v14, %v376_v8  ;;  %v1661_v18 = vpop.f32.mrf.mxu1 }
 0x20f   : > { %v556_v19 = vpop.f32.mrf.mxu0  ;;  %1748 = vmatprep.subr.msk.bf16.mxu1 %vm732_vm0, %v2037_v13  ;;  %v734_v20 = vsel %vm732_vm0, %v2037_v13, 0 }
 0x210   : > { %v2043_v21 = vpack.c.bf16 %v555_v17, %v551_v15  ;;  %v604_v22 = vpop.f32.mrf.mxu1  ;;  %1671 = vmatpush3.bf16.msra.mxu1 %v734_v20  ;;  %v557_v29 = vadd.f32 %v556_v19, %v380_v26 }
 0x211   : > { %v605_v24 = vadd.f32 %v604_v22, %v384_v6  ;;  %v560_v25 = vpop.f32.mrf.mxu0 }
 0x212   : > { %1666 = vmatprep.mubr.msk.bf16.mxu0 %vm622_vm1, %v2043_v21  ;;  %v2053_v35 = vpack.c.bf16 %v557_v29, %v553_v32  ;;  %v561_v38 = vadd.f32 %v560_v25, %v376_v8 }
 0x213   : > { %v2047_v27 = vpack.c.bf16 %v605_v24, %v602_v23  ;;  %v562_v28 = vpop.f32.mrf.mxu0 }
 0x214   : > { %v563_v30 = vadd.f32 %v562_v28, %v380_v26  ;;  %v630_v37 = vsel %vm622_vm1, %v2053_v35, 0  ;;  %v2063_v39 = vpack.c.bf16 %v561_v38, %v561_v38 }
 0x215   : > { %v564_v31 = vpop.f32.mrf.mxu0  ;;  %1672 = vmatprep.subr.bf16.mxu1 %v2047_v27 }
 0x216   : > { %v2050_v33 = vpack.c.bf16 %v563_v30, %v563_v30  ;;  %1673 = vmatpush3.bf16.msra.mxu1 %v2047_v27 }
 0x217   : > { %v565_v34 = vpop.f32.mrf.mxu0 }
 0x218   : > { %1746 = vmatprep.subr.msk.bf16.mxu0 %vm622_vm1, %v2050_v33  ;;  %v633_v36 = vsel %vm622_vm1, %v2050_v33, 0 }
 0x219   : > { %1663 = vmatpush3.bf16.xpose.msra.mxu0 %v633_v36 }
 0x21a   : > { %1747 = vmatprep.subr.msk.bf16.mxu0 %vm622_vm1, %v2053_v35 }
 0x221   : > { %1665 = vmatpush3.bf16.xpose.msra.mxu0 %v630_v37 }
 0x228   : > { %1667 = vmatmul.mubr.msk.bf16.vlgmr.msra.gmra.mxu0 %vm622_vm1, %v2063_v39 }
 0x2e8   : > { %v1668_v41 = vpop.f32.mrf.mxu0 }
 0x2e9   : > { %v687_v46 = vsel %vm617_vm2, %v1668_v41, -inf }
 0x2ea   : > { %v669_v42 = vpop.f32.mrf.mxu0  ;;  %v695_v49 = vsel %vm688_vm3, %v687_v46, -inf }
 0x2eb   : > { %v685_v43 = vsel %vm617_vm2, %v669_v42, -inf }
 0x2ec   : > { %v1669_v44 = vpop.f32.mrf.mxu0  ;;  %v689_v45 = vsel %vm688_vm3, %v685_v43, -inf }
 0x2ed   : > { %690 = vmax.xlane.f32.xlu0 %v689_v45 }
 0x2ee   : > { %v672_v47 = vpop.f32.mrf.mxu0 }
 0x2ef   : > { %v686_v48 = vsel %vm617_vm2, %v672_v47, -inf }
 0x2f0   : > { %v692_v50 = vsel %vm688_vm3, %v686_v48, -inf }
 0x2f1   : > { %696 = vmax.xlane.f32.xlu0 %v695_v49  ;;  %693 = vmax.xlane.f32.xlu1 %v692_v50 }
 0x376   : > { %v691_v51 = vpop.xlane.xlu0 %690 }
 0x377   : > { %v698_v52 = vsub.f32 %v685_v43, %v691_v51 }
 0x379   : > { %v701_v53 = vmul.f32 1.442695, %v698_v52 }
 0x37a   : > { %v697_v54 = vpop.xlane.xlu0 %696  ;;  %v694_v55 = vpop.xlane.xlu1 %693 }
 0x37b   : > { %1817 = vpow2.f32 %v701_v53  ;;  %v700_v56 = vsub.f32 %v687_v46, %v697_v54  ;;  %v699_v57 = vsub.f32 %v686_v48, %v694_v55 }
 0x37d   : > { %v705_v58 = vmul.f32 1.442695, %v700_v56  ;;  %v703_v59 = vmul.f32 1.442695, %v699_v57 }
 0x37f   : > { %1819 = vpow2.f32 %v705_v58 }
 0x380   : > { %1821 = vpow2.f32 %v703_v59 }
 0x388   : > { %v1818_v60 = vpop.eup %1817 }
 0x389   : > { %v707_v61 = vsel %vm688_vm3, %v1818_v60, 0.0 }
 0x38a   : > { %708 = vadd.xlane.f32.xlu1 %v707_v61 }
 0x38c   : > { %v1820_v62 = vpop.eup %1819 }
 0x38d   : > { %v1822_v63 = vpop.eup %1821  ;;  %v713_v0 = vsel %vm688_vm3, %v1820_v62, 0.0 }
 0x38e   : > { %714 = vadd.xlane.f32.xlu1 %v713_v0  ;;  %v710_v1 = vsel %vm688_vm3, %v1822_v63, 0.0 }
 0x38f   : > { %711 = vadd.xlane.f32.xlu0 %v710_v1 }
 0x39f   : > { %795 = vrot.lane.b32.xlu1 %v2053_v35, %s1877_s23 }
 0x3a3   : > { %789 = vrot.lane.b32.xlu1 %v2043_v21, %s1877_s23 }
 0x3a5   : > { %797 = vrot.lane.b32.xlu0 %v2050_v33, %s1877_s23 }
 0x3a7   : > { %983 = vrot.lane.b32.xlu1 %v2050_v33, %s1878_s27 }
 0x3a9   : > { %791 = vrot.lane.b32.xlu0 %v2063_v39, %s1877_s23 }
 0x3ab   : > { %981 = vrot.lane.b32.xlu1 %v2053_v35, %s1878_s27 }
 0x3ad   : > { %977 = vrot.lane.b32.xlu0 %v2043_v21, %s1878_s27 }
 0x3af   : > { %979 = vrot.lane.b32.xlu1 %v2063_v39, %s1878_s27 }
 0x413   : > { %v709_v2 = vpop.xlane.xlu1 %708 }
 0x414   : > { %1823 = vrcp.f32 %v709_v2 }
 0x417   : > { %v715_v3 = vpop.xlane.xlu1 %714 }
 0x418   : > { %v712_v4 = vpop.xlane.xlu0 %711  ;;  %1825 = vrcp.f32 %v715_v3 }
 0x419   : > { %1827 = vrcp.f32 %v712_v4 }
 0x41b   : > { %v796_v9 = vpop.permute.xlu1 %795 }
 0x41c   : > { %v798_v5 = vpop.permute.xlu0 %797  ;;  %v806_v18 = vsel %vm622_vm1, %v796_v9, 0 }
 0x41d   : > { %1749 = vmatprep.subr.msk.bf16.mxu1 %vm622_vm1, %v798_v5  ;;  %v809_v16 = vsel %vm622_vm1, %v798_v5, 0 }
 0x41f   : > { %v790_v17 = vpop.permute.xlu1 %789 }
 0x420   : > { %v792_v20 = vpop.permute.xlu0 %791 }
 0x421   : > { %v1824_v6 = vpop.eup %1823 }
 0x422   : > { %v719_v11 = vmul.f32 %v1824_v6, %v1818_v60 }
 0x423   : > { %v984_v19 = vpop.permute.xlu1 %983 }
 0x424   : > { %v978_v22 = vpop.permute.xlu0 %977  ;;  %v995_v23 = vsel %vm622_vm1, %v984_v19, 0 }
 0x425   : > { %v1826_v7 = vpop.eup %1825 }
 0x426   : > { %v1828_v8 = vpop.eup %1827  ;;  %v721_v10 = vmul.f32 %v1826_v7, %v1820_v62 }
 0x427   : > { %v720_v12 = vmul.f32 %v1828_v8, %v1822_v63  ;;  %v982_v24 = vpop.permute.xlu1 %981 }
 0x428   : > { %v723_v14 = vpack.c.bf16 %v721_v10, %v721_v10  ;;  %v992_v25 = vsel %vm622_vm1, %v982_v24, 0 }
 0x429   : > { %v722_v15 = vpack.c.bf16 %v720_v12, %v719_v11 }
 0x42b   : > { %1674 = vmatprep.mubr.msk.bf16.mxu1 %vm688_vm3, %v722_v15  ;;  %v980_v26 = vpop.permute.xlu1 %979 }
 0x42c   : > { %1675 = vmatmul.mubr.msk.bf16.vlgmr.msra.gmra.mxu1 %vm688_vm3, %v723_v14 }
 0x42d   : > { %1679 = vmatpush3.bf16.xpose.msra.mxu1 %v809_v16  ;;  %1682 = vmatprep.mubr.msk.bf16.mxu1 %vm622_vm1, %v790_v17 }
 0x42e   : > { %1750 = vmatprep.subr.msk.bf16.mxu1 %vm622_vm1, %v796_v9 }
 0x435   : > { %1681 = vmatpush3.bf16.xpose.msra.mxu1 %v806_v18 }
 0x436   : > { %1752 = vmatprep.subr.msk.bf16.mxu1 %vm622_vm1, %v984_v19 }
 0x43c   : > { %1683 = vmatmul.mubr.msk.bf16.vlgmr.msra.gmra.mxu1 %vm622_vm1, %v792_v20 }
 0x43d   : > { %1695 = vmatpush3.bf16.xpose.msra.mxu1 %v995_v23  ;;  %1698 = vmatprep.mubr.msk.bf16.mxu1 %vm622_vm1, %v978_v22 }
 0x43e   : > { %1753 = vmatprep.subr.msk.bf16.mxu1 %vm622_vm1, %v982_v24 }
 0x445   : > { %1697 = vmatpush3.bf16.xpose.msra.mxu1 %v992_v25 }
 0x44c   : > { %1699 = vmatmul.mubr.msk.bf16.vlgmr.msra.gmra.mxu1 %vm622_vm1, %v980_v26 }
 0x4ec   : > { %v1676_v28 = vpop.f32.mrf.mxu1 }
 0x4ed   : > { %786 = vst.msk [vmem:[#allocation2 + $0x10] sm:$0xff] %vm622_vm1, %v1676_v28 }
 0x4ee   : > { %v770_v29 = vpop.f32.mrf.mxu1 }
 0x4ef   : > { %784 = vst.msk [vmem:[#allocation2] sm:$0xff] %vm622_vm1, %v770_v29 }
 0x4f0   : > { %v1677_v30 = vpop.f32.mrf.mxu1 }
 0x4f2   : > { %v773_v31 = vpop.f32.mrf.mxu1 }
 0x4f3   : > { %785 = vst.msk [vmem:[#allocation2 + $0x8] sm:$0xff] %vm622_vm1, %v773_v31 }
 0x4fc   : > { %v1684_v32 = vpop.f32.mrf.mxu1 }
 0x4fe   : > { %v845_v34 = vpop.f32.mrf.mxu1 }
 0x4ff   : > { %v859_v1 = vsel %vm617_vm2, %v845_v34, -inf }
 0x500   : > { %v1685_v36 = vpop.f32.mrf.mxu1  ;;  %v862_v2 = vsel %vm688_vm3, %v859_v1, -inf }
 0x502   : > { %v848_v37 = vpop.f32.mrf.mxu1 }
 0x503   : > { %v860_v3 = vsel %vm617_vm2, %v848_v37, -inf }
 0x50c   : > { %v1700_v38 = vpop.f32.mrf.mxu1 }
 0x50d   : > { %v1047_v45 = vsel %vm617_vm2, %v1700_v38, -inf }
 0x50e   : > { %v1031_v41 = vpop.f32.mrf.mxu1  ;;  %v1054_v48 = vsel %vm688_vm3, %v1047_v45, -inf }
 0x50f   : > { %v1045_v42 = vsel %vm617_vm2, %v1031_v41, -inf }
 0x510   : > { %v1701_v43 = vpop.f32.mrf.mxu1  ;;  %v1048_v44 = vsel %vm688_vm3, %v1045_v42, -inf }
 0x511   : > { %1049 = vmax.xlane.f32.xlu0 %v1048_v44 }
 0x512   : > { %v1034_v46 = vpop.f32.mrf.mxu1 }
 0x513   : > { %v1046_v47 = vsel %vm617_vm2, %v1034_v46, -inf }
 0x514   : > { %v1051_v49 = vsel %vm688_vm3, %v1046_v47, -inf }
 0x515   : > { %1055 = vmax.xlane.f32.xlu0 %v1054_v48  ;;  %1052 = vmax.xlane.f32.xlu1 %v1051_v49 }
 0x59a   : > { %v1050_v50 = vpop.xlane.xlu0 %1049 }
 0x59b   : > { %v1057_v51 = vsub.f32 %v1045_v42, %v1050_v50 }
 0x59d   : > { %v1060_v52 = vmul.f32 1.442695, %v1057_v51 }
 0x59e   : > { %v1056_v53 = vpop.xlane.xlu0 %1055  ;;  %v1053_v54 = vpop.xlane.xlu1 %1052 }
 0x59f   : > { %1829 = vpow2.f32 %v1060_v52  ;;  %v1059_v55 = vsub.f32 %v1047_v45, %v1056_v53  ;;  %v1058_v56 = vsub.f32 %v1046_v47, %v1053_v54 }
 0x5a1   : > { %v1064_v57 = vmul.f32 1.442695, %v1059_v55  ;;  %v1062_v58 = vmul.f32 1.442695, %v1058_v56 }
 0x5a3   : > { %1831 = vpow2.f32 %v1064_v57 }
 0x5a4   : > { %1833 = vpow2.f32 %v1062_v58 }
 0x5ac   : > { %v1830_v59 = vpop.eup %1829 }
 0x5ad   : > { %v1066_v60 = vsel %vm688_vm3, %v1830_v59, 0.0 }
 0x5ae   : > { %1067 = vadd.xlane.f32.xlu0 %v1066_v60 }
 0x5b0   : > { %v1832_v61 = vpop.eup %1831 }
 0x5b1   : > { %v1834_v62 = vpop.eup %1833  ;;  %v1072_v63 = vsel %vm688_vm3, %v1832_v61, 0.0 }
 0x5b2   : > { %1073 = vadd.xlane.f32.xlu1 %v1072_v63  ;;  %v1069_v0 = vsel %vm688_vm3, %v1834_v62, 0.0 }
 0x5b3   : > { %1070 = vadd.xlane.f32.xlu0 %v1069_v0 }
 0x5c3   : > { %1083 = vrot.lane.b32.xlu1 %v2047_v27, %s1878_s27 }
 0x5c7   : > { %1167 = vrot.lane.b32.xlu1 %v2050_v33, %s1879_s28  ;;  %v861_v33 = vsel %vm617_vm2, %v1684_v32, -inf }
 0x5c9   : > { %1085 = vrot.lane.b32.xlu0 %v2037_v13, %s1878_s27 }
 0x5cb   : > { %1165 = vrot.lane.b32.xlu1 %v2053_v35, %s1879_s28  ;;  %v868_v35 = vsel %vm688_vm3, %v861_v33, -inf }
 0x5cd   : > { %1161 = vrot.lane.b32.xlu0 %v2043_v21, %s1879_s28  ;;  %v865_v21 = vsel %vm688_vm3, %v860_v3, -inf }
 0x5cf   : > { %1163 = vrot.lane.b32.xlu1 %v2063_v39, %s1879_s28 }
 0x5ec   : > { %863 = vmax.xlane.f32.xlu0 %v862_v2 }
 0x5f0   : > { %869 = vmax.xlane.f32.xlu0 %v868_v35 }
 0x5f3   : > { %866 = vmax.xlane.f32.xlu1 %v865_v21 }
 0x637   : > { %v1068_v4 = vpop.xlane.xlu0 %1067 }
 0x638   : > { %1835 = vrcp.f32 %v1068_v4 }
 0x63b   : > { %v1074_v39 = vpop.xlane.xlu1 %1073 }
 0x63c   : > { %v1071_v5 = vpop.xlane.xlu0 %1070  ;;  %1837 = vrcp.f32 %v1074_v39 }
 0x63d   : > { %1839 = vrcp.f32 %v1071_v5 }
 0x63f   : > { %v1084_v7 = vpop.permute.xlu1 %1083 }
 0x640   : > { %v1086_v6 = vpop.permute.xlu0 %1085 }
 0x641   : > { %v1095_v8 = vsel %vm732_vm0, %v1086_v6, 0  ;;  %1754 = vmatprep.subr.msk.bf16.mxu1 %vm732_vm0, %v1086_v6 }
 0x642   : > { %1703 = vmatpush3.bf16.msra.mxu1 %v1095_v8 }
 0x643   : > { %1704 = vmatprep.subr.bf16.mxu1 %v1084_v7  ;;  %v1168_v9 = vpop.permute.xlu1 %1167 }
 0x644   : > { %v1162_v19 = vpop.permute.xlu0 %1161  ;;  %v1179_v20 = vsel %vm622_vm1, %v1168_v9, 0 }
 0x645   : > { %v1836_v10 = vpop.eup %1835 }
 0x646   : > { %1705 = vmatpush3.bf16.msra.mxu1 %v1084_v7  ;;  %v1078_v15 = vmul.f32 %v1836_v10, %v1830_v59 }
 0x647   : > { %1755 = vmatprep.subr.msk.bf16.mxu1 %vm622_vm1, %v1168_v9  ;;  %v1166_v22 = vpop.permute.xlu1 %1165 }
 0x648   : > { %v1176_v23 = vsel %vm622_vm1, %v1166_v22, 0 }
 0x649   : > { %v1838_v11 = vpop.eup %1837 }
 0x64a   : > { %v1840_v12 = vpop.eup %1839  ;;  %v1080_v14 = vmul.f32 %v1838_v11, %v1832_v61 }
 0x64b   : > { %v1079_v16 = vmul.f32 %v1840_v12, %v1834_v62  ;;  %v1164_v24 = vpop.permute.xlu1 %1163 }
 0x64c   : > { %v1082_v17 = vpack.c.bf16 %v1080_v14, %v1080_v14 }
 0x64d   : > { %v1081_v18 = vpack.c.bf16 %v1079_v16, %v1078_v15 }
 0x64f   : > { %1706 = vmatprep.mubr.msk.bf16.mxu1 %vm688_vm3, %v1081_v18 }
 0x650   : > { %1707 = vmatmul.mubr.msk.bf16.vlgmr.msra.gmra.mxu1 %vm688_vm3, %v1082_v17 }
 0x651   : > { %1711 = vmatpush3.bf16.xpose.msra.mxu1 %v1179_v20  ;;  %1714 = vmatprep.mubr.msk.bf16.mxu1 %vm622_vm1, %v1162_v19 }
 0x652   : > { %1756 = vmatprep.subr.msk.bf16.mxu1 %vm622_vm1, %v1166_v22 }
 0x659   : > { %1713 = vmatpush3.bf16.xpose.msra.mxu1 %v1176_v23 }
 0x660   : > { %1715 = vmatmul.mubr.msk.bf16.vlgmr.msra.gmra.mxu1 %vm622_vm1, %v1164_v24 }
 0x675   : > { %v864_v28 = vpop.xlane.xlu0 %863 }
 0x676   : > { %v871_v32 = vsub.f32 %v859_v1, %v864_v28 }
 0x678   : > { %v874_v37 = vmul.f32 1.442695, %v871_v32 }
 0x679   : > { %v870_v36 = vpop.xlane.xlu0 %869 }
 0x67a   : > { %v873_v38 = vsub.f32 %v861_v33, %v870_v36 }
 0x67c   : > { %v867_v25 = vpop.xlane.xlu1 %866  ;;  %v878_v41 = vmul.f32 1.442695, %v873_v38  ;;  %v1803_v38 = vld [vmem:[%s2250_s5 + $0x38] sm:$0xff]  }
 0x67d   : > { %v872_v26 = vsub.f32 %v860_v3, %v867_v25 }
 0x67f   : > { %v876_v30 = vmul.f32 1.442695, %v872_v26 }
 0x681   : > { %1841 = vpow2.f32 %v876_v30 }
 0x682   : > { %1843 = vpow2.f32 %v874_v37 }
 0x683   : > { %1845 = vpow2.f32 %v878_v41  ;;  %v1804_v41 = vld [vmem:[%s2250_s5 + $0x30] sm:$0xff]  }
 0x68e   : > { %v1842_v47 = vpop.eup %1841 }
 0x68f   : > { %v883_v52 = vsel %vm688_vm3, %v1842_v47, 0.0  ;;  %v1844_v55 = vpop.eup %1843 }
 0x690   : > { %v880_v56 = vsel %vm688_vm3, %v1844_v55, 0.0  ;;  %v1846_v57 = vpop.eup %1845 }
 0x691   : > { %v886_v58 = vsel %vm688_vm3, %v1846_v57, 0.0 }
 0x710   : > { %v2158_v29 = vpop.f32.mrf.mxu1 }
 0x712   : > { %v2160_v31 = vpop.f32.mrf.mxu1 }
 0x714   : > { %v1709_v34 = vpop.f32.mrf.mxu1 }
 0x716   : > { %v2162_v42 = vpop.f32.mrf.mxu1 }
 0x720   : > { %v1716_v43 = vpop.f32.mrf.mxu1 }
 0x721   : > { %v1231_v44 = vsel %vm617_vm2, %v1716_v43, -inf  ;;  %v1805_v43 = vld [vmem:[%s2250_s5 + $0x28] sm:$0xff]  }
 0x722   : > { %v1215_v45 = vpop.f32.mrf.mxu1  ;;  %v1238_v46 = vsel %vm688_vm3, %v1231_v44, -inf }
 0x723   : > { %v1229_v48 = vsel %vm617_vm2, %v1215_v45, -inf  ;;  %1239 = vmax.xlane.f32.xlu1 %v1238_v46  ;;  %v1807_v45 = vld [vmem:[%s2250_s5 + $0x18] sm:$0xff]  }
 0x724   : > { %v1717_v49 = vpop.f32.mrf.mxu1  ;;  %v1232_v50 = vsel %vm688_vm3, %v1229_v48, -inf }
 0x725   : > { %1233 = vmax.xlane.f32.xlu0 %v1232_v50 }
 0x726   : > { %v1218_v51 = vpop.f32.mrf.mxu1 }
 0x727   : > { %v1230_v53 = vsel %vm617_vm2, %v1218_v51, -inf  ;;  %884 = vadd.xlane.f32.xlu1 %v883_v52  ;;  %v1809_v51 = vld [vmem:[%s2250_s5 + $0x8] sm:$0xff]  }
 0x728   : > { %v1235_v54 = vsel %vm688_vm3, %v1230_v53, -inf }
 0x729   : > { %1236 = vmax.xlane.f32.xlu0 %v1235_v54 }
 0x72d   : > { %881 = vadd.xlane.f32.xlu0 %v880_v56 }
 0x731   : > { %887 = vadd.xlane.f32.xlu0 %v886_v58 }
 0x7ac   : > { %v1240_v59 = vpop.xlane.xlu1 %1239 }
 0x7ad   : > { %v1243_v60 = vsub.f32 %v1231_v44, %v1240_v59  ;;  %v1806_v44 = vld [vmem:[%s2250_s5 + $0x20] sm:$0xff]  }
 0x7ae   : > { %v1234_v61 = vpop.xlane.xlu0 %1233 }
 0x7af   : > { %v1248_v62 = vmul.f32 1.442695, %v1243_v60  ;;  %v1241_v63 = vsub.f32 %v1229_v48, %v1234_v61  ;;  %v1808_v48 = vld [vmem:[%s2250_s5 + $0x10] sm:$0xff]  }
 0x7b0   : > { %v885_v1 = vpop.xlane.xlu1 %884 }
 0x7b1   : > { %1847 = vpow2.f32 %v1248_v62  ;;  %v1244_v40 = vmul.f32 1.442695, %v1241_v63 }
 0x7b2   : > { %v1237_v0 = vpop.xlane.xlu0 %1236 }
 0x7b3   : > { %1849 = vpow2.f32 %v1244_v40  ;;  %v1242_v2 = vsub.f32 %v1230_v53, %v1237_v0  ;;  %v1810_v53 = vld [vmem:[%s2250_s5] sm:$0xff]  }
 0x7b4   : > { %1851 = vrcp.f32 %v885_v1 }
 0x7b5   : > { %v1246_v33 = vmul.f32 1.442695, %v1242_v2 }
 0x7b6   : > { %v882_v3 = vpop.xlane.xlu0 %881 }
 0x7b7   : > { %1853 = vpow2.f32 %v1246_v33  ;;  %v1579_v33 = vld [vmem:[%s2251_s6] ss:$0 sm:$0xff] }
 0x7b8   : > { %1855 = vrcp.f32 %v882_v3 }
 0x7ba   : > { %v888_v12 = vpop.xlane.xlu0 %887 }
 0x7bb   : > { %1857 = vrcp.f32 %v888_v12 }
 0x7be   : > { %v1848_v35 = vpop.eup %1847 }
 0x7bf   : > { %v1256_v21 = vsel %vm688_vm3, %v1848_v35, 0.0 }
 0x7c0   : > { %v1850_v4 = vpop.eup %1849  ;;  %1257 = vadd.xlane.f32.xlu1 %v1256_v21 }
 0x7c1   : > { %v1852_v39 = vpop.eup %1851  ;;  %v1250_v5 = vsel %vm688_vm3, %v1850_v4, 0.0 }
 0x7c2   : > { %v893_v10 = vmul.f32 %v1852_v39, %v1842_v47 }
 0x7c4   : > { %v1854_v6 = vpop.eup %1853  ;;  %1251 = vadd.xlane.f32.xlu1 %v1250_v5 }
 0x7c5   : > { %v1856_v7 = vpop.eup %1855  ;;  %v1253_v8 = vsel %vm688_vm3, %v1854_v6, 0.0 }
 0x7c6   : > { %1254 = vadd.xlane.f32.xlu0 %v1253_v8  ;;  %v892_v9 = vmul.f32 %v1856_v7, %v1844_v55  ;;  %v1866_v7 = vld [vmem:[%s1936_s29] sm:$0xff] }
 0x7c8   : > { %v895_v11 = vpack.c.bf16 %v893_v10, %v892_v9  ;;  %v1858_v18 = vpop.eup %1857 }
 0x7ca   : > { %1690 = vmatprep.mubr.msk.bf16.mxu0 %vm688_vm3, %v895_v11  ;;  %v1867_v11 = vld [vmem:[%s1936_s29 + $0x8] sm:$0xff] }
 0x7d5   : > { %899 = vrot.lane.b32.xlu1 %v2047_v27, %s1877_s23 }
 0x7d9   : > { %1269 = vrot.lane.b32.xlu1 %v2037_v13, %s1879_s28 }
 0x7dc   : > { %901 = vrot.lane.b32.xlu0 %v2037_v13, %s1877_s23  ;;  %v894_v13 = vmul.f32 %v1858_v18, %v1846_v57 }
 0x7dd   : > { %1267 = vrot.lane.b32.xlu1 %v2047_v27, %s1879_s28 }
 0x7de   : > { %v896_v23 = vpack.c.bf16 %v894_v13, %v894_v13 }
 0x849   : > { %v1258_v14 = vpop.xlane.xlu1 %1257 }
 0x84a   : > { %1859 = vrcp.f32 %v1258_v14 }
 0x84d   : > { %v1252_v15 = vpop.xlane.xlu1 %1251 }
 0x84e   : > { %1861 = vrcp.f32 %v1252_v15 }
 0x84f   : > { %v1255_v16 = vpop.xlane.xlu0 %1254 }
 0x850   : > { %1863 = vrcp.f32 %v1255_v16 }
 0x851   : > { %v900_v17 = vpop.permute.xlu1 %899 }
 0x853   : > { %v902_v19 = vpop.permute.xlu0 %901 }
 0x854   : > { %v911_v20 = vsel %vm732_vm0, %v902_v19, 0  ;;  %1751 = vmatprep.subr.msk.bf16.mxu0 %vm732_vm0, %v902_v19 }
 0x855   : > { %1687 = vmatpush3.bf16.msra.mxu0 %v911_v20  ;;  %v1270_v22 = vpop.permute.xlu1 %1269 }
 0x856   : > { %1688 = vmatprep.subr.bf16.mxu0 %v900_v17  ;;  %v1279_v25 = vsel %vm732_vm0, %v1270_v22, 0 }
 0x857   : > { %v1860_v27 = vpop.eup %1859 }
 0x858   : > { %v1264_v34 = vmul.f32 %v1860_v27, %v1848_v35 }
 0x859   : > { %1689 = vmatpush3.bf16.msra.mxu0 %v900_v17  ;;  %v1268_v28 = vpop.permute.xlu1 %1267 }
 0x85a   : > { %1757 = vmatprep.subr.msk.bf16.mxu0 %vm732_vm0, %v1270_v22  ;;  %v1266_v37 = vpack.c.bf16 %v1264_v34, %v1264_v34 }
 0x85b   : > { %v1862_v24 = vpop.eup %1861 }
 0x85c   : > { %1691 = vmatmul.mubr.msk.bf16.vlgmr.msra.gmra.mxu0 %vm688_vm3, %v896_v23  ;;  %v1262_v30 = vmul.f32 %v1862_v24, %v1850_v4  ;;  %v1865_v4 = vld [vmem:[%s1936_s29 + $0x10] sm:$0xff] }
 0x85d   : > { %v1864_v26 = vpop.eup %1863  ;;  %1719 = vmatpush3.bf16.msra.mxu0 %v1279_v25 }
 0x85e   : > { %1720 = vmatprep.subr.bf16.mxu0 %v1268_v28  ;;  %v1263_v32 = vmul.f32 %v1864_v26, %v1854_v6 }
 0x860   : > { %v1265_v36 = vpack.c.bf16 %v1263_v32, %v1262_v30 }
 0x861   : > { %1721 = vmatpush3.bf16.msra.mxu0 %v1268_v28 }
 0x862   : > { %1722 = vmatprep.mubr.msk.bf16.mxu0 %vm688_vm3, %v1265_v36  ;;  %1726 = vmatprep.subr.bf16.mxu0 %v1803_v38 }
 0x864   : > { %1723 = vmatmul.mubr.msk.bf16.vlgmr.msra.gmra.mxu0 %vm688_vm3, %v1266_v37 }
 0x865   : > { %1727 = vmatpush3.bf16.msra.mxu0 %v1803_v38 }
 0x866   : > { %1728 = vmatprep.subr.bf16.mxu0 %v1804_v41 }
 0x869   : > { %1729 = vmatpush3.bf16.msra.mxu0 %v1804_v41 }
 0x86a   : > { %1730 = vmatprep.subr.bf16.mxu0 %v1805_v43 }
 0x86d   : > { %1731 = vmatpush3.bf16.msra.mxu0 %v1805_v43 }
 0x86e   : > { %1732 = vmatprep.subr.bf16.mxu0 %v1806_v44 }
 0x871   : > { %1733 = vmatpush3.bf16.msra.mxu0 %v1806_v44 }
 0x872   : > { %1734 = vmatprep.subr.bf16.mxu0 %v1807_v45 }
 0x875   : > { %1735 = vmatpush3.bf16.msra.mxu0 %v1807_v45 }
 0x876   : > { %1736 = vmatprep.subr.bf16.mxu0 %v1808_v48 }
 0x879   : > { %1737 = vmatpush3.bf16.msra.mxu0 %v1808_v48 }
 0x87a   : > { %1738 = vmatprep.subr.bf16.mxu0 %v1809_v51 }
 0x87d   : > { %1739 = vmatpush3.bf16.msra.mxu0 %v1809_v51 }
 0x87e   : > { %1740 = vmatprep.subr.bf16.mxu0 %v1810_v53 }
 0x881   : > { %1741 = vmatpush3.bf16.msra.mxu0 %v1810_v53 }
 0x91c   : > { %v1692_v46 = vpop.f32.mrf.mxu0 }
 0x91e   : > { %v947_v47 = vpop.f32.mrf.mxu0 }
 0x91f   : > { %964 = vrot.lane.b32.xlu0 %v947_v47, %s1879_s28 }
 0x920   : > { %v1693_v49 = vpop.f32.mrf.mxu0 }
 0x922   : > { %v950_v50 = vpop.f32.mrf.mxu0 }
 0x923   : > { %968 = vrot.lane.b32.xlu0 %v1692_v46, %s1879_s28  ;;  %966 = vrot.lane.b32.xlu1 %v950_v50, %s1879_s28 }
 0x924   : > { %v1724_v52 = vpop.f32.mrf.mxu0 }
 0x926   : > { %v1315_v54 = vpop.f32.mrf.mxu0 }
 0x927   : > { %1150 = vrot.lane.b32.xlu0 %v2162_v42, %s1878_s27  ;;  %1148 = vrot.lane.b32.xlu1 %v2160_v31, %s1878_s27 }
 0x928   : > { %v1725_v55 = vpop.f32.mrf.mxu0 }
 0x92a   : > { %v1318_v56 = vpop.f32.mrf.mxu0 }
 0x92b   : > { %1152 = vrot.lane.b32.xlu1 %v2158_v29, %s1878_s27  ;;  %1332 = vrot.lane.b32.xlu0 %v1315_v54, %s1877_s23 }
 0x92f   : > { %1336 = vrot.lane.b32.xlu0 %v1724_v52, %s1877_s23  ;;  %1334 = vrot.lane.b32.xlu1 %v1318_v56, %s1877_s23 }
 0x991   : > { %v965_v57 = vpop.permute.xlu0 %964 }
 0x992   : > { %974 = vst.msk [vmem:[#allocation2] sm:$0xff] %vm973_vm4, %v965_v57 }
 0x995   : > { %v969_v42 = vpop.permute.xlu0 %968  ;;  %v967_v58 = vpop.permute.xlu1 %966 }
 0x996   : > { %976 = vst.msk [vmem:[#allocation2 + $0x10] sm:$0xff] %vm973_vm4, %v969_v42  ;;  %975 = vst.msk [vmem:[#allocation2 + $0x8] sm:$0xff] %vm973_vm4, %v967_v58 }
 0x999   : > { %v1151_v31 = vpop.permute.xlu0 %1150  ;;  %v1149_v59 = vpop.permute.xlu1 %1148 }
 0x99a   : > { %1159 = vst.msk [vmem:[#allocation2 + $0x8] sm:$0xff] %vm1157_vm5, %v1151_v31  ;;  %1158 = vst.msk [vmem:[#allocation2] sm:$0xff] %vm1157_vm5, %v1149_v59 }
 0x99d   : > { %v1333_v29 = vpop.permute.xlu0 %1332  ;;  %v1153_v60 = vpop.permute.xlu1 %1152 }
 0x99e   : > { %1342 = vst.msk [vmem:[#allocation2] sm:$0xff] %vm1341_vm6, %v1333_v29 }
 0x99f   : > { %1160 = vst.msk [vmem:[#allocation2 + $0x10] sm:$0xff] %vm1157_vm5, %v1153_v60 }
 0x9a1   : > { %v1337_v61 = vpop.permute.xlu0 %1336  ;;  %v1335_v62 = vpop.permute.xlu1 %1334 }
 0x9a2   : > { %1344 = vst.msk [vmem:[#allocation2 + $0x10] sm:$0xff] %vm1341_vm6, %v1337_v61  ;;  %1343 = vst.msk [vmem:[#allocation2 + $0x8] sm:$0xff] %vm1341_vm6, %v1335_v62 }
 0x9a5   : > { %v1345_v63 = vld [vmem:[#allocation2] sm:$0xff] }
 0x9a9   : > { %v1346_v40 = vld [vmem:[#allocation2 + $0x8] sm:$0xff]  ;;  %v1347_v0 = vld [vmem:[#allocation2 + $0x10] sm:$0xff] }
 0x9aa   : > { %v1348_v1 = vpack.c.bf16 %v1346_v40, %v1345_v63  ;;  %v1349_v2 = vpack.c.bf16 %v1347_v0, %v1347_v0 }
 0x9ac   : > { %1742 = vmatprep.mubr.bf16.mxu0 %v1348_v1 }
 0x9ad   : > { %1743 = vmatmul.mubr.bf16.vlgmr.msra.gmra.mxu0 %v1349_v2 }
 0xa6d   : > { %v1744_v3 = vpop.f32.mrf.mxu0 }
 0xa6e   : > { %v1464_v35 = vadd.f32 %v1744_v3, %v1579_v33 }
 0xa6f   : > { %v1455_v21 = vpop.f32.mrf.mxu0 }
 0xa70   : > { %v1471_v39 = vadd.f32 %v1865_v4, %v1464_v35  ;;  %v1456_v5 = vadd.f32 %v1579_v33, %v1455_v21 }
 0xa71   : > { %v1745_v6 = vpop.f32.mrf.mxu0 }
 0xa72   : > { %1474 = vst [vmem:[%s278_s8 + $0x10] sm:$0xff] %v1471_v39  ;;  %v1469_v8 = vadd.f32 %v1866_v7, %v1456_v5 }
 0xa73   : > { %v1458_v9 = vpop.f32.mrf.mxu0 }
 0xa74   : > { %1472 = vst [vmem:[%s278_s8] sm:$0xff] %v1469_v8  ;;  %v1459_v10 = vadd.f32 %v1579_v33, %v1458_v9 }
 0xa76   : > { %v1470_v12 = vadd.f32 %v1867_v11, %v1459_v10 }
 0xa78   : > { %1473 = vst [vmem:[%s278_s8 + $0x8] sm:$0xff] %v1470_v12 }
 0xa79 PF: > { %s17_s24 = sadd.s32 1, %s1874_s24  }
 0xa7a   : > { %p14_p4 = scmp.ge.s32.totalorder %s17_s24, 4  }
 0xa7c   :  { %16 = sbr.rel (!%p14_p4) target bundleno = 1 (0x1), region = 78 }

</bundles_post_ra>
